<compile_context>
chip_gen: v6e
topology: v6e:2x2x1
jax: 0.10.0
libtpu: 0.0.40
codegen_flags: <defaults>
</compile_context>

<pallas_src>
import functools

import jax
import jax.numpy as jnp
from jax import lax
from jax.experimental import pallas as pl
from jax.experimental.pallas import tpu as pltpu


def _cdiv(a, b):
    return -(-a // b)


def _round_up(x, m):
    return _cdiv(x, m) * m


def _fused_kernel(*refs, ksize, dilation, g, wp, wo, c_in, c_out, th_p,
                  has_halo, hold_dw, use_scratch_acc):
    """One (batch, packed-H-tile) grid step of depthwise KxK + pointwise 1x1 (stride 1).

    Refs (in order):
      x_ref   : (C, H_blk, g*Wp)  packed input super-rows of this tile (plus the extra
                                  rows below when the whole image is one tile)
      xh_ref  : (C, HB, g*Wp)     halo super-rows just below the tile  [only if has_halo]
      wdw_ref : (C, K*K) f32      depthwise weights (SMEM scalars)
      wpw_ref : (O, C)   f32      pointwise weights (SMEM scalars)
      o_ref   : (O, TH_p, W_blk)  output block
      acc_ref : (O, TH_p, W_blk)  f32 VMEM accumulator  [only if use_scratch_acc]

    Each packed super-row holds g consecutive padded-H rows side by side on the lane
    axis, so even W=16 images use (almost) all 128 lanes.
    """
    it = iter(refs)
    x_ref = next(it)
    xh_ref = next(it) if has_halo else None
    wdw_ref = next(it)
    wpw_ref = next(it)
    o_ref = next(it)
    acc_ref = next(it) if use_scratch_acc else None

    width_in = g * wp

    def depthwise_plane(c):
        strips = {}

        def strip(j):
            # Packed super-rows [j, j + th_p) of channel c (f32), stitched from the
            # main block and (for multi-tile grids) the halo block -- no full-tile
            # VMEM->VMEM copy.
            if j not in strips:
                if j > 0 and has_halo:
                    s = jnp.concatenate([x_ref[c, j:, :], xh_ref[c, :j, :]], axis=0)
                else:
                    s = x_ref[c, j:j + th_p, :]
                strips[j] = s.astype(jnp.float32)
            return strips[j]

        cats = {}

        def cat(q):
            # Lane concat of strips q and q+1 (2*g*Wp wide) for cross-segment taps.
            if q not in cats:
                cats[q] = jnp.concatenate([strip(q), strip(q + 1)], axis=-1)
            return cats[q]

        acc = None
        for kh in range(ksize):
            r = kh * dilation
            q, m = divmod(r, g)
            for kw in range(ksize):
                off = kw * dilation
                if g == 1:
                    tap = strip(r)[:, off:off + wo]
                elif m == 0 and off == 0:
                    tap = strip(q)
                else:
                    start = m * wp + off
                    tap = cat(q)[:, start:start + width_in]
                term = tap * wdw_ref[c, kh * ksize + kw]
                acc = term if acc is None else acc + term
        return acc

    # TODO(synk): for large channel counts (C >= ~128 on v5e / ~256 on v6e/v7x) stage
    # the depthwise planes as a (TH*W, C) VMEM tile and run the pointwise contraction
    # as one jnp.dot on the MXU (and drive the channel loop with lax.fori_loop).
    if hold_dw:
        # Small C*plane: keep every depthwise plane in vregs and store each output
        # plane exactly once (minimal pressure on the vector-store slot).
        planes = [depthwise_plane(c) for c in range(c_in)]
        for oc in range(c_out):
            out = planes[0] * wpw_ref[oc, 0]
            for c in range(1, c_in):
                out = out + planes[c] * wpw_ref[oc, c]
            o_ref[oc, :, :] = out.astype(o_ref.dtype)
    else:
        # Big tiles: stream channels and accumulate in memory so that at most ~one
        # plane is ever live in vregs (no spills at realistic tile sizes).
        acc_tgt = acc_ref if use_scratch_acc else o_ref
        for c in range(c_in):
            dw = depthwise_plane(c)
            for oc in range(c_out):
                term = dw * wpw_ref[oc, c]
                if c == 0:
                    acc_tgt[oc, :, :] = term
                else:
                    acc_tgt[oc, :, :] = acc_tgt[oc, :, :] + term
        if use_scratch_acc:
            for oc in range(c_out):
                o_ref[oc, :, :] = acc_ref[oc, :, :].astype(o_ref.dtype)


def separable_conv2d(x, dw_weight, pw_weight, *, stride=1, padding=0, dilation=1):
    """SeparableConv2d forward (bias=False), NCHW in / NCHW out.

    x:         (N, C, H, W)
    dw_weight: (C, 1, K, K)   depthwise conv weight (groups=C)
    pw_weight: (O, C, 1, 1)   pointwise 1x1 conv weight
    returns    (N, O, Ho, Wo)
    """
    n, c, h, w = x.shape
    k = dw_weight.shape[-1]
    o = pw_weight.shape[0]
    itemsize = jnp.dtype(x.dtype).itemsize
    out_is_f32 = (x.dtype == jnp.float32)

    span = dilation * (k - 1)
    hp = h + 2 * padding
    wp = w + 2 * padding
    ho1 = hp - span                       # stride-1 output height (kernel computes
    wo1 = wp - span                       # stride 1; stride>1 is a subsample of it)
    assert ho1 >= 1 and wo1 >= 1, "kernel does not cover the padded input"

    # ---- lane packing: g consecutive padded rows share one 128-lane row ---------
    g = 128 // wp if wp < 128 else 1
    g = max(1, min(g, ho1))
    width_in = g * wp                     # packed input row width (lane axis)
    w_blk = width_in if g > 1 else wo1    # kernel output-block width
    ho_p = _cdiv(ho1, g)                  # output rows, in packed super-rows

    if span == 0:
        extra = 0                         # no vertical halo at all (K == 1)
    elif g == 1:
        extra = span
    else:
        extra = span // g + 1             # extra super-rows read below a tile

    # ---- per-generation VMEM budget & H tiling -----------------------------------
    try:
        vmem_cap = int(pltpu.get_tpu_info().vmem_capacity_bytes)
    except Exception:                     # conservative fallback (v7x-sized)
        vmem_cap = 64 * 1024 * 1024
    budget = min(vmem_cap * 5 // 8, 96 * 1024 * 1024)

    hb = _round_up(max(extra, 1), 8)      # halo block super-rows (sublane aligned)
    per_row = (2 * c * width_in + 2 * o * w_blk) * itemsize
    if not out_is_f32:
        per_row += o * w_blk * 4          # possible f32 accumulator scratch
    halo_bytes = 2 * c * hb * width_in * itemsize
    th_budget = max(1, (budget - halo_bytes) // per_row)

    if th_budget >= ho_p:
        th_p, n_tiles = ho_p, 1
    else:
        th_p = max(hb, th_budget // hb * hb)   # round DOWN to the halo block size
        n_tiles = _cdiv(ho_p, th_p)

    # v7x has 2 TensorCores sharded over "parallel" grid axes: keep >= 2 steps.
    if n * n_tiles < 2 and ho_p >= 2 * hb:
        th_p = _round_up(_cdiv(ho_p, 2), hb)
        n_tiles = _cdiv(ho_p, th_p)

    has_halo = (n_tiles > 1) and (extra > 0)
    if n_tiles == 1:
        sup_total = th_p + extra          # whole image in one block (includes halo)
        in_h_blk = sup_total
    else:
        sup_total = n_tiles * th_p + (hb if has_halo else 0)
        in_h_blk = th_p

    # ---- pad + lane-pack the input (contiguous NCHW reshape, no transpose) -------
    pad_bottom = sup_total * g - h - padding
    xp = jnp.pad(x, ((0, 0), (0, 0), (padding, pad_bottom), (padding, padding)))
    xp = xp.reshape(n, c, sup_total, width_in)

    w_dw = dw_weight.reshape(c, k * k).astype(jnp.float32)   # (C, K*K)
    w_pw = pw_weight.reshape(o, c).astype(jnp.float32)       # (O, C)

    # Register- vs memory-resident pointwise accumulation.
    plane_vregs = _cdiv(th_p, 8) * _cdiv(w_blk, 128)
    hold_dw = (c + 2) * plane_vregs <= 24
    use_scratch_acc = (not hold_dw) and (not out_is_f32)

    in_specs = [pl.BlockSpec((None, c, in_h_blk, width_in),
                             lambda b, t: (b, 0, t, 0))]
    call_args = [xp]
    if has_halo:
        hr = th_p // hb
        in_specs.append(pl.BlockSpec((None, c, hb, width_in),
                                     lambda b, t, hr=hr: (b, 0, (t + 1) * hr, 0)))
        call_args.append(xp)
    in_specs += [pl.BlockSpec(memory_space=pltpu.MemorySpace.SMEM),
                 pl.BlockSpec(memory_space=pltpu.MemorySpace.SMEM)]
    call_args += [w_dw, w_pw]

    scratch_shapes = []
    if use_scratch_acc:
        scratch_shapes.append(pltpu.VMEM((o, th_p, w_blk), jnp.float32))

    # vmem_limit from the actual per-step footprint (double-buffered blocks) + margin.
    foot = 2 * c * in_h_blk * width_in * itemsize + 2 * o * th_p * w_blk * itemsize
    if has_halo:
        foot += halo_bytes
    if use_scratch_acc:
        foot += o * th_p * w_blk * 4
    vmem_limit = max(foot + foot // 2 + (2 << 20), 16 << 20)
    vmem_limit = min(max(vmem_limit, foot + (1 << 20)), int(vmem_cap * 0.9))

    kernel = functools.partial(
        _fused_kernel, ksize=k, dilation=dilation, g=g, wp=wp, wo=wo1,
        c_in=c, c_out=o, th_p=th_p, has_halo=has_halo,
        hold_dw=hold_dw, use_scratch_acc=use_scratch_acc)

    out = pl.pallas_call(
        kernel,
        out_shape=jax.ShapeDtypeStruct((n, o, n_tiles * th_p, w_blk), x.dtype),
        grid_spec=pltpu.PrefetchScalarGridSpec(
            num_scalar_prefetch=0,
            grid=(n, n_tiles),
            in_specs=in_specs,
            out_specs=pl.BlockSpec((None, o, th_p, w_blk),
                                   lambda b, t: (b, 0, t, 0)),
            scratch_shapes=tuple(scratch_shapes)),
        compiler_params=pltpu.CompilerParams(
            dimension_semantics=("parallel", "parallel"),
            vmem_limit_bytes=int(vmem_limit)),
    )(*call_args)

    # Un-pack: (N, O, T, g*Wp) -> (N, O, T*g, Wp) is a contiguous reshape; then trim.
    if g > 1:
        out = out.reshape(n, o, n_tiles * th_p * g, wp)[:, :, :ho1, :wo1]
    else:
        out = out[:, :, :ho1, :]
    if stride != 1:
        # TODO(synk): fold stride>1 into the kernel via strided sublane/lane ref reads
        # instead of computing the dense stride-1 output and subsampling it here.
        out = out[:, :, ::stride, ::stride]
    return out


def _reference(x, dw_weight, pw_weight, *, stride, padding, dilation):
    c = x.shape[1]
    dn = ("NCHW", "OIHW", "NCHW")
    dw = lax.conv_general_dilated(
        x, dw_weight, window_strides=(stride, stride),
        padding=[(padding, padding), (padding, padding)],
        rhs_dilation=(dilation, dilation),
        dimension_numbers=dn, feature_group_count=c)
    return lax.conv_general_dilated(
        dw, pw_weight, window_strides=(1, 1), padding="VALID",
        dimension_numbers=dn)


if __name__ == "__main__":
    # Module config: in_channels=4, out_channels=8, kernel_size=3, stride=1,
    # padding=1, dilation=1, bias=False.
    N, C, H, W = 2, 4, 16, 16
    O, K = 8, 3
    stride, padding, dilation = 1, 1, 1

    key = jax.random.PRNGKey(0)
    kx, kdw, kpw = jax.random.split(key, 3)
    x = jax.random.normal(kx, (N, C, H, W), jnp.float32)
    dw_weight = jax.random.normal(kdw, (C, 1, K, K), jnp.float32) * 0.1  # depthwise
    pw_weight = jax.random.normal(kpw, (O, C, 1, 1), jnp.float32) * 0.1  # pointwise 1x1

    out = separable_conv2d(x, dw_weight, pw_weight,
                           stride=stride, padding=padding, dilation=dilation)
    out = jax.block_until_ready(out)

    ref = _reference(x, dw_weight, pw_weight,
                     stride=stride, padding=padding, dilation=dilation)
    assert out.shape == ref.shape, (out.shape, ref.shape)
    err = float(jnp.max(jnp.abs(out - ref)))
    assert err < 1e-4, err

    print("KERNEL_OK")
</pallas_src>

<mosaic_0001>
module attributes {stable_mosaic.version = 11 : i64} {
  func.func @_fused_kernel(%arg0: i32, %arg1: i32, %arg2: memref<1x4x4x126xf32, #tpu.memory_space<vmem>>, %arg3: memref<4x9xf32, #tpu.memory_space<smem>>, %arg4: memref<8x4xf32, #tpu.memory_space<smem>>, %arg5: memref<1x8x3x126xf32, #tpu.memory_space<vmem>>) attributes {dimension_semantics = [#tpu.dimension_semantics<parallel>, #tpu.dimension_semantics<parallel>], iteration_bounds = array<i64: 2, 1>, scalar_prefetch = 0 : i64, scratch_operands = 0 : i64, tpu.core_type = #tpu.core_type<tc>, window_params = [{transform_indices = @transform_0, window_bounds = array<i64: 1, 4, 4, 126>}, {transform_indices = @transform_1, window_bounds = array<i64: 4, 9>}, {transform_indices = @transform_2, window_bounds = array<i64: 8, 4>}, {transform_indices = @transform_3, window_bounds = array<i64: 1, 8, 3, 126>}]} {
    %c0 = arith.constant 0 : index
    %c0_0 = arith.constant 0 : index
    %c0_1 = arith.constant 0 : index
    %c0_2 = arith.constant 0 : index
    %0 = vector.load %arg2[%c0, %c0_0, %c0_1, %c0_2] : memref<1x4x4x126xf32, #tpu.memory_space<vmem>>, vector<1x1x3x126xf32>
    %1 = vector.shape_cast %0 : vector<1x1x3x126xf32> to vector<3x126xf32>
    %c0_3 = arith.constant 0 : index
    %c0_4 = arith.constant 0 : index
    %2 = memref.load %arg3[%c0_3, %c0_4] : memref<4x9xf32, #tpu.memory_space<smem>>
    %3 = vector.broadcast %2 : f32 to vector<3x126xf32>
    %4 = arith.mulf %1, %3 : vector<3x126xf32>
    %c0_5 = arith.constant 0 : index
    %c0_6 = arith.constant 0 : index
    %c1 = arith.constant 1 : index
    %c0_7 = arith.constant 0 : index
    %5 = vector.load %arg2[%c0_5, %c0_6, %c1, %c0_7] : memref<1x4x4x126xf32, #tpu.memory_space<vmem>>, vector<1x1x3x126xf32>
    %6 = vector.shape_cast %5 : vector<1x1x3x126xf32> to vector<3x126xf32>
    %7 = tpu.concatenate %1, %6 in 1 : vector<3x126xf32>, vector<3x126xf32> -> vector<3x252xf32>
    %8 = vector.extract_strided_slice %7 {offsets = [0, 1], sizes = [3, 126], strides = [1, 1]} : vector<3x252xf32> to vector<3x126xf32>
    %c0_8 = arith.constant 0 : index
    %c1_9 = arith.constant 1 : index
    %9 = memref.load %arg3[%c0_8, %c1_9] : memref<4x9xf32, #tpu.memory_space<smem>>
    %10 = vector.broadcast %9 : f32 to vector<3x126xf32>
    %11 = arith.mulf %8, %10 : vector<3x126xf32>
    %12 = arith.addf %4, %11 : vector<3x126xf32>
    %13 = vector.extract_strided_slice %7 {offsets = [0, 2], sizes = [3, 126], strides = [1, 1]} : vector<3x252xf32> to vector<3x126xf32>
    %c0_10 = arith.constant 0 : index
    %c2 = arith.constant 2 : index
    %14 = memref.load %arg3[%c0_10, %c2] : memref<4x9xf32, #tpu.memory_space<smem>>
    %15 = vector.broadcast %14 : f32 to vector<3x126xf32>
    %16 = arith.mulf %13, %15 : vector<3x126xf32>
    %17 = arith.addf %12, %16 : vector<3x126xf32>
    %18 = vector.extract_strided_slice %7 {offsets = [0, 18], sizes = [3, 126], strides = [1, 1]} : vector<3x252xf32> to vector<3x126xf32>
    %c0_11 = arith.constant 0 : index
    %c3 = arith.constant 3 : index
    %19 = memref.load %arg3[%c0_11, %c3] : memref<4x9xf32, #tpu.memory_space<smem>>
    %20 = vector.broadcast %19 : f32 to vector<3x126xf32>
    %21 = arith.mulf %18, %20 : vector<3x126xf32>
    %22 = arith.addf %17, %21 : vector<3x126xf32>
    %23 = vector.extract_strided_slice %7 {offsets = [0, 19], sizes = [3, 126], strides = [1, 1]} : vector<3x252xf32> to vector<3x126xf32>
    %c0_12 = arith.constant 0 : index
    %c4 = arith.constant 4 : index
    %24 = memref.load %arg3[%c0_12, %c4] : memref<4x9xf32, #tpu.memory_space<smem>>
    %25 = vector.broadcast %24 : f32 to vector<3x126xf32>
    %26 = arith.mulf %23, %25 : vector<3x126xf32>
    %27 = arith.addf %22, %26 : vector<3x126xf32>
    %28 = vector.extract_strided_slice %7 {offsets = [0, 20], sizes = [3, 126], strides = [1, 1]} : vector<3x252xf32> to vector<3x126xf32>
    %c0_13 = arith.constant 0 : index
    %c5 = arith.constant 5 : index
    %29 = memref.load %arg3[%c0_13, %c5] : memref<4x9xf32, #tpu.memory_space<smem>>
    %30 = vector.broadcast %29 : f32 to vector<3x126xf32>
    %31 = arith.mulf %28, %30 : vector<3x126xf32>
    %32 = arith.addf %27, %31 : vector<3x126xf32>
    %33 = vector.extract_strided_slice %7 {offsets = [0, 36], sizes = [3, 126], strides = [1, 1]} : vector<3x252xf32> to vector<3x126xf32>
    %c0_14 = arith.constant 0 : index
    %c6 = arith.constant 6 : index
    %34 = memref.load %arg3[%c0_14, %c6] : memref<4x9xf32, #tpu.memory_space<smem>>
    %35 = vector.broadcast %34 : f32 to vector<3x126xf32>
    %36 = arith.mulf %33, %35 : vector<3x126xf32>
    %37 = arith.addf %32, %36 : vector<3x126xf32>
    %38 = vector.extract_strided_slice %7 {offsets = [0, 37], sizes = [3, 126], strides = [1, 1]} : vector<3x252xf32> to vector<3x126xf32>
    %c0_15 = arith.constant 0 : index
    %c7 = arith.constant 7 : index
    %39 = memref.load %arg3[%c0_15, %c7] : memref<4x9xf32, #tpu.memory_space<smem>>
    %40 = vector.broadcast %39 : f32 to vector<3x126xf32>
    %41 = arith.mulf %38, %40 : vector<3x126xf32>
    %42 = arith.addf %37, %41 : vector<3x126xf32>
    %43 = vector.extract_strided_slice %7 {offsets = [0, 38], sizes = [3, 126], strides = [1, 1]} : vector<3x252xf32> to vector<3x126xf32>
    %c0_16 = arith.constant 0 : index
    %c8 = arith.constant 8 : index
    %44 = memref.load %arg3[%c0_16, %c8] : memref<4x9xf32, #tpu.memory_space<smem>>
    %45 = vector.broadcast %44 : f32 to vector<3x126xf32>
    %46 = arith.mulf %43, %45 : vector<3x126xf32>
    %47 = arith.addf %42, %46 : vector<3x126xf32>
    %c0_17 = arith.constant 0 : index
    %c1_18 = arith.constant 1 : index
    %c0_19 = arith.constant 0 : index
    %c0_20 = arith.constant 0 : index
    %48 = vector.load %arg2[%c0_17, %c1_18, %c0_19, %c0_20] : memref<1x4x4x126xf32, #tpu.memory_space<vmem>>, vector<1x1x3x126xf32>
    %49 = vector.shape_cast %48 : vector<1x1x3x126xf32> to vector<3x126xf32>
    %c1_21 = arith.constant 1 : index
    %c0_22 = arith.constant 0 : index
    %50 = memref.load %arg3[%c1_21, %c0_22] : memref<4x9xf32, #tpu.memory_space<smem>>
    %51 = vector.broadcast %50 : f32 to vector<3x126xf32>
    %52 = arith.mulf %49, %51 : vector<3x126xf32>
    %c0_23 = arith.constant 0 : index
    %c1_24 = arith.constant 1 : index
    %c1_25 = arith.constant 1 : index
    %c0_26 = arith.constant 0 : index
    %53 = vector.load %arg2[%c0_23, %c1_24, %c1_25, %c0_26] : memref<1x4x4x126xf32, #tpu.memory_space<vmem>>, vector<1x1x3x126xf32>
    %54 = vector.shape_cast %53 : vector<1x1x3x126xf32> to vector<3x126xf32>
    %55 = tpu.concatenate %49, %54 in 1 : vector<3x126xf32>, vector<3x126xf32> -> vector<3x252xf32>
    %56 = vector.extract_strided_slice %55 {offsets = [0, 1], sizes = [3, 126], strides = [1, 1]} : vector<3x252xf32> to vector<3x126xf32>
    %c1_27 = arith.constant 1 : index
    %c1_28 = arith.constant 1 : index
    %57 = memref.load %arg3[%c1_27, %c1_28] : memref<4x9xf32, #tpu.memory_space<smem>>
    %58 = vector.broadcast %57 : f32 to vector<3x126xf32>
    %59 = arith.mulf %56, %58 : vector<3x126xf32>
    %60 = arith.addf %52, %59 : vector<3x126xf32>
    %61 = vector.extract_strided_slice %55 {offsets = [0, 2], sizes = [3, 126], strides = [1, 1]} : vector<3x252xf32> to vector<3x126xf32>
    %c1_29 = arith.constant 1 : index
    %c2_30 = arith.constant 2 : index
    %62 = memref.load %arg3[%c1_29, %c2_30] : memref<4x9xf32, #tpu.memory_space<smem>>
    %63 = vector.broadcast %62 : f32 to vector<3x126xf32>
    %64 = arith.mulf %61, %63 : vector<3x126xf32>
    %65 = arith.addf %60, %64 : vector<3x126xf32>
    %66 = vector.extract_strided_slice %55 {offsets = [0, 18], sizes = [3, 126], strides = [1, 1]} : vector<3x252xf32> to vector<3x126xf32>
    %c1_31 = arith.constant 1 : index
    %c3_32 = arith.constant 3 : index
    %67 = memref.load %arg3[%c1_31, %c3_32] : memref<4x9xf32, #tpu.memory_space<smem>>
    %68 = vector.broadcast %67 : f32 to vector<3x126xf32>
    %69 = arith.mulf %66, %68 : vector<3x126xf32>
    %70 = arith.addf %65, %69 : vector<3x126xf32>
    %71 = vector.extract_strided_slice %55 {offsets = [0, 19], sizes = [3, 126], strides = [1, 1]} : vector<3x252xf32> to vector<3x126xf32>
    %c1_33 = arith.constant 1 : index
    %c4_34 = arith.constant 4 : index
    %72 = memref.load %arg3[%c1_33, %c4_34] : memref<4x9xf32, #tpu.memory_space<smem>>
    %73 = vector.broadcast %72 : f32 to vector<3x126xf32>
    %74 = arith.mulf %71, %73 : vector<3x126xf32>
    %75 = arith.addf %70, %74 : vector<3x126xf32>
    %76 = vector.extract_strided_slice %55 {offsets = [0, 20], sizes = [3, 126], strides = [1, 1]} : vector<3x252xf32> to vector<3x126xf32>
    %c1_35 = arith.constant 1 : index
    %c5_36 = arith.constant 5 : index
    %77 = memref.load %arg3[%c1_35, %c5_36] : memref<4x9xf32, #tpu.memory_space<smem>>
    %78 = vector.broadcast %77 : f32 to vector<3x126xf32>
    %79 = arith.mulf %76, %78 : vector<3x126xf32>
    %80 = arith.addf %75, %79 : vector<3x126xf32>
    %81 = vector.extract_strided_slice %55 {offsets = [0, 36], sizes = [3, 126], strides = [1, 1]} : vector<3x252xf32> to vector<3x126xf32>
    %c1_37 = arith.constant 1 : index
    %c6_38 = arith.constant 6 : index
    %82 = memref.load %arg3[%c1_37, %c6_38] : memref<4x9xf32, #tpu.memory_space<smem>>
    %83 = vector.broadcast %82 : f32 to vector<3x126xf32>
    %84 = arith.mulf %81, %83 : vector<3x126xf32>
    %85 = arith.addf %80, %84 : vector<3x126xf32>
    %86 = vector.extract_strided_slice %55 {offsets = [0, 37], sizes = [3, 126], strides = [1, 1]} : vector<3x252xf32> to vector<3x126xf32>
    %c1_39 = arith.constant 1 : index
    %c7_40 = arith.constant 7 : index
    %87 = memref.load %arg3[%c1_39, %c7_40] : memref<4x9xf32, #tpu.memory_space<smem>>
    %88 = vector.broadcast %87 : f32 to vector<3x126xf32>
    %89 = arith.mulf %86, %88 : vector<3x126xf32>
    %90 = arith.addf %85, %89 : vector<3x126xf32>
    %91 = vector.extract_strided_slice %55 {offsets = [0, 38], sizes = [3, 126], strides = [1, 1]} : vector<3x252xf32> to vector<3x126xf32>
    %c1_41 = arith.constant 1 : index
    %c8_42 = arith.constant 8 : index
    %92 = memref.load %arg3[%c1_41, %c8_42] : memref<4x9xf32, #tpu.memory_space<smem>>
    %93 = vector.broadcast %92 : f32 to vector<3x126xf32>
    %94 = arith.mulf %91, %93 : vector<3x126xf32>
    %95 = arith.addf %90, %94 : vector<3x126xf32>
    %c0_43 = arith.constant 0 : index
    %c2_44 = arith.constant 2 : index
    %c0_45 = arith.constant 0 : index
    %c0_46 = arith.constant 0 : index
    %96 = vector.load %arg2[%c0_43, %c2_44, %c0_45, %c0_46] : memref<1x4x4x126xf32, #tpu.memory_space<vmem>>, vector<1x1x3x126xf32>
    %97 = vector.shape_cast %96 : vector<1x1x3x126xf32> to vector<3x126xf32>
    %c2_47 = arith.constant 2 : index
    %c0_48 = arith.constant 0 : index
    %98 = memref.load %arg3[%c2_47, %c0_48] : memref<4x9xf32, #tpu.memory_space<smem>>
    %99 = vector.broadcast %98 : f32 to vector<3x126xf32>
    %100 = arith.mulf %97, %99 : vector<3x126xf32>
    %c0_49 = arith.constant 0 : index
    %c2_50 = arith.constant 2 : index
    %c1_51 = arith.constant 1 : index
    %c0_52 = arith.constant 0 : index
    %101 = vector.load %arg2[%c0_49, %c2_50, %c1_51, %c0_52] : memref<1x4x4x126xf32, #tpu.memory_space<vmem>>, vector<1x1x3x126xf32>
    %102 = vector.shape_cast %101 : vector<1x1x3x126xf32> to vector<3x126xf32>
    %103 = tpu.concatenate %97, %102 in 1 : vector<3x126xf32>, vector<3x126xf32> -> vector<3x252xf32>
    %104 = vector.extract_strided_slice %103 {offsets = [0, 1], sizes = [3, 126], strides = [1, 1]} : vector<3x252xf32> to vector<3x126xf32>
    %c2_53 = arith.constant 2 : index
    %c1_54 = arith.constant 1 : index
    %105 = memref.load %arg3[%c2_53, %c1_54] : memref<4x9xf32, #tpu.memory_space<smem>>
    %106 = vector.broadcast %105 : f32 to vector<3x126xf32>
    %107 = arith.mulf %104, %106 : vector<3x126xf32>
    %108 = arith.addf %100, %107 : vector<3x126xf32>
    %109 = vector.extract_strided_slice %103 {offsets = [0, 2], sizes = [3, 126], strides = [1, 1]} : vector<3x252xf32> to vector<3x126xf32>
    %c2_55 = arith.constant 2 : index
    %c2_56 = arith.constant 2 : index
    %110 = memref.load %arg3[%c2_55, %c2_56] : memref<4x9xf32, #tpu.memory_space<smem>>
    %111 = vector.broadcast %110 : f32 to vector<3x126xf32>
    %112 = arith.mulf %109, %111 : vector<3x126xf32>
    %113 = arith.addf %108, %112 : vector<3x126xf32>
    %114 = vector.extract_strided_slice %103 {offsets = [0, 18], sizes = [3, 126], strides = [1, 1]} : vector<3x252xf32> to vector<3x126xf32>
    %c2_57 = arith.constant 2 : index
    %c3_58 = arith.constant 3 : index
    %115 = memref.load %arg3[%c2_57, %c3_58] : memref<4x9xf32, #tpu.memory_space<smem>>
    %116 = vector.broadcast %115 : f32 to vector<3x126xf32>
    %117 = arith.mulf %114, %116 : vector<3x126xf32>
    %118 = arith.addf %113, %117 : vector<3x126xf32>
    %119 = vector.extract_strided_slice %103 {offsets = [0, 19], sizes = [3, 126], strides = [1, 1]} : vector<3x252xf32> to vector<3x126xf32>
    %c2_59 = arith.constant 2 : index
    %c4_60 = arith.constant 4 : index
    %120 = memref.load %arg3[%c2_59, %c4_60] : memref<4x9xf32, #tpu.memory_space<smem>>
    %121 = vector.broadcast %120 : f32 to vector<3x126xf32>
    %122 = arith.mulf %119, %121 : vector<3x126xf32>
    %123 = arith.addf %118, %122 : vector<3x126xf32>
    %124 = vector.extract_strided_slice %103 {offsets = [0, 20], sizes = [3, 126], strides = [1, 1]} : vector<3x252xf32> to vector<3x126xf32>
    %c2_61 = arith.constant 2 : index
    %c5_62 = arith.constant 5 : index
    %125 = memref.load %arg3[%c2_61, %c5_62] : memref<4x9xf32, #tpu.memory_space<smem>>
    %126 = vector.broadcast %125 : f32 to vector<3x126xf32>
    %127 = arith.mulf %124, %126 : vector<3x126xf32>
    %128 = arith.addf %123, %127 : vector<3x126xf32>
    %129 = vector.extract_strided_slice %103 {offsets = [0, 36], sizes = [3, 126], strides = [1, 1]} : vector<3x252xf32> to vector<3x126xf32>
    %c2_63 = arith.constant 2 : index
    %c6_64 = arith.constant 6 : index
    %130 = memref.load %arg3[%c2_63, %c6_64] : memref<4x9xf32, #tpu.memory_space<smem>>
    %131 = vector.broadcast %130 : f32 to vector<3x126xf32>
    %132 = arith.mulf %129, %131 : vector<3x126xf32>
    %133 = arith.addf %128, %132 : vector<3x126xf32>
    %134 = vector.extract_strided_slice %103 {offsets = [0, 37], sizes = [3, 126], strides = [1, 1]} : vector<3x252xf32> to vector<3x126xf32>
    %c2_65 = arith.constant 2 : index
    %c7_66 = arith.constant 7 : index
    %135 = memref.load %arg3[%c2_65, %c7_66] : memref<4x9xf32, #tpu.memory_space<smem>>
    %136 = vector.broadcast %135 : f32 to vector<3x126xf32>
    %137 = arith.mulf %134, %136 : vector<3x126xf32>
    %138 = arith.addf %133, %137 : vector<3x126xf32>
    %139 = vector.extract_strided_slice %103 {offsets = [0, 38], sizes = [3, 126], strides = [1, 1]} : vector<3x252xf32> to vector<3x126xf32>
    %c2_67 = arith.constant 2 : index
    %c8_68 = arith.constant 8 : index
    %140 = memref.load %arg3[%c2_67, %c8_68] : memref<4x9xf32, #tpu.memory_space<smem>>
    %141 = vector.broadcast %140 : f32 to vector<3x126xf32>
    %142 = arith.mulf %139, %141 : vector<3x126xf32>
    %143 = arith.addf %138, %142 : vector<3x126xf32>
    %c0_69 = arith.constant 0 : index
    %c3_70 = arith.constant 3 : index
    %c0_71 = arith.constant 0 : index
    %c0_72 = arith.constant 0 : index
    %144 = vector.load %arg2[%c0_69, %c3_70, %c0_71, %c0_72] : memref<1x4x4x126xf32, #tpu.memory_space<vmem>>, vector<1x1x3x126xf32>
    %145 = vector.shape_cast %144 : vector<1x1x3x126xf32> to vector<3x126xf32>
    %c3_73 = arith.constant 3 : index
    %c0_74 = arith.constant 0 : index
    %146 = memref.load %arg3[%c3_73, %c0_74] : memref<4x9xf32, #tpu.memory_space<smem>>
    %147 = vector.broadcast %146 : f32 to vector<3x126xf32>
    %148 = arith.mulf %145, %147 : vector<3x126xf32>
    %c0_75 = arith.constant 0 : index
    %c3_76 = arith.constant 3 : index
    %c1_77 = arith.constant 1 : index
    %c0_78 = arith.constant 0 : index
    %149 = vector.load %arg2[%c0_75, %c3_76, %c1_77, %c0_78] : memref<1x4x4x126xf32, #tpu.memory_space<vmem>>, vector<1x1x3x126xf32>
    %150 = vector.shape_cast %149 : vector<1x1x3x126xf32> to vector<3x126xf32>
    %151 = tpu.concatenate %145, %150 in 1 : vector<3x126xf32>, vector<3x126xf32> -> vector<3x252xf32>
    %152 = vector.extract_strided_slice %151 {offsets = [0, 1], sizes = [3, 126], strides = [1, 1]} : vector<3x252xf32> to vector<3x126xf32>
    %c3_79 = arith.constant 3 : index
    %c1_80 = arith.constant 1 : index
    %153 = memref.load %arg3[%c3_79, %c1_80] : memref<4x9xf32, #tpu.memory_space<smem>>
    %154 = vector.broadcast %153 : f32 to vector<3x126xf32>
    %155 = arith.mulf %152, %154 : vector<3x126xf32>
    %156 = arith.addf %148, %155 : vector<3x126xf32>
    %157 = vector.extract_strided_slice %151 {offsets = [0, 2], sizes = [3, 126], strides = [1, 1]} : vector<3x252xf32> to vector<3x126xf32>
    %c3_81 = arith.constant 3 : index
    %c2_82 = arith.constant 2 : index
    %158 = memref.load %arg3[%c3_81, %c2_82] : memref<4x9xf32, #tpu.memory_space<smem>>
    %159 = vector.broadcast %158 : f32 to vector<3x126xf32>
    %160 = arith.mulf %157, %159 : vector<3x126xf32>
    %161 = arith.addf %156, %160 : vector<3x126xf32>
    %162 = vector.extract_strided_slice %151 {offsets = [0, 18], sizes = [3, 126], strides = [1, 1]} : vector<3x252xf32> to vector<3x126xf32>
    %c3_83 = arith.constant 3 : index
    %c3_84 = arith.constant 3 : index
    %163 = memref.load %arg3[%c3_83, %c3_84] : memref<4x9xf32, #tpu.memory_space<smem>>
    %164 = vector.broadcast %163 : f32 to vector<3x126xf32>
    %165 = arith.mulf %162, %164 : vector<3x126xf32>
    %166 = arith.addf %161, %165 : vector<3x126xf32>
    %167 = vector.extract_strided_slice %151 {offsets = [0, 19], sizes = [3, 126], strides = [1, 1]} : vector<3x252xf32> to vector<3x126xf32>
    %c3_85 = arith.constant 3 : index
    %c4_86 = arith.constant 4 : index
    %168 = memref.load %arg3[%c3_85, %c4_86] : memref<4x9xf32, #tpu.memory_space<smem>>
    %169 = vector.broadcast %168 : f32 to vector<3x126xf32>
    %170 = arith.mulf %167, %169 : vector<3x126xf32>
    %171 = arith.addf %166, %170 : vector<3x126xf32>
    %172 = vector.extract_strided_slice %151 {offsets = [0, 20], sizes = [3, 126], strides = [1, 1]} : vector<3x252xf32> to vector<3x126xf32>
    %c3_87 = arith.constant 3 : index
    %c5_88 = arith.constant 5 : index
    %173 = memref.load %arg3[%c3_87, %c5_88] : memref<4x9xf32, #tpu.memory_space<smem>>
    %174 = vector.broadcast %173 : f32 to vector<3x126xf32>
    %175 = arith.mulf %172, %174 : vector<3x126xf32>
    %176 = arith.addf %171, %175 : vector<3x126xf32>
    %177 = vector.extract_strided_slice %151 {offsets = [0, 36], sizes = [3, 126], strides = [1, 1]} : vector<3x252xf32> to vector<3x126xf32>
    %c3_89 = arith.constant 3 : index
    %c6_90 = arith.constant 6 : index
    %178 = memref.load %arg3[%c3_89, %c6_90] : memref<4x9xf32, #tpu.memory_space<smem>>
    %179 = vector.broadcast %178 : f32 to vector<3x126xf32>
    %180 = arith.mulf %177, %179 : vector<3x126xf32>
    %181 = arith.addf %176, %180 : vector<3x126xf32>
    %182 = vector.extract_strided_slice %151 {offsets = [0, 37], sizes = [3, 126], strides = [1, 1]} : vector<3x252xf32> to vector<3x126xf32>
    %c3_91 = arith.constant 3 : index
    %c7_92 = arith.constant 7 : index
    %183 = memref.load %arg3[%c3_91, %c7_92] : memref<4x9xf32, #tpu.memory_space<smem>>
    %184 = vector.broadcast %183 : f32 to vector<3x126xf32>
    %185 = arith.mulf %182, %184 : vector<3x126xf32>
    %186 = arith.addf %181, %185 : vector<3x126xf32>
    %187 = vector.extract_strided_slice %151 {offsets = [0, 38], sizes = [3, 126], strides = [1, 1]} : vector<3x252xf32> to vector<3x126xf32>
    %c3_93 = arith.constant 3 : index
    %c8_94 = arith.constant 8 : index
    %188 = memref.load %arg3[%c3_93, %c8_94] : memref<4x9xf32, #tpu.memory_space<smem>>
    %189 = vector.broadcast %188 : f32 to vector<3x126xf32>
    %190 = arith.mulf %187, %189 : vector<3x126xf32>
    %191 = arith.addf %186, %190 : vector<3x126xf32>
    %c0_95 = arith.constant 0 : index
    %c0_96 = arith.constant 0 : index
    %192 = memref.load %arg4[%c0_95, %c0_96] : memref<8x4xf32, #tpu.memory_space<smem>>
    %193 = vector.broadcast %192 : f32 to vector<3x126xf32>
    %194 = arith.mulf %47, %193 : vector<3x126xf32>
    %c0_97 = arith.constant 0 : index
    %c1_98 = arith.constant 1 : index
    %195 = memref.load %arg4[%c0_97, %c1_98] : memref<8x4xf32, #tpu.memory_space<smem>>
    %196 = vector.broadcast %195 : f32 to vector<3x126xf32>
    %197 = arith.mulf %95, %196 : vector<3x126xf32>
    %198 = arith.addf %194, %197 : vector<3x126xf32>
    %c0_99 = arith.constant 0 : index
    %c2_100 = arith.constant 2 : index
    %199 = memref.load %arg4[%c0_99, %c2_100] : memref<8x4xf32, #tpu.memory_space<smem>>
    %200 = vector.broadcast %199 : f32 to vector<3x126xf32>
    %201 = arith.mulf %143, %200 : vector<3x126xf32>
    %202 = arith.addf %198, %201 : vector<3x126xf32>
    %c0_101 = arith.constant 0 : index
    %c3_102 = arith.constant 3 : index
    %203 = memref.load %arg4[%c0_101, %c3_102] : memref<8x4xf32, #tpu.memory_space<smem>>
    %204 = vector.broadcast %203 : f32 to vector<3x126xf32>
    %205 = arith.mulf %191, %204 : vector<3x126xf32>
    %206 = arith.addf %202, %205 : vector<3x126xf32>
    %c0_103 = arith.constant 0 : index
    %c0_104 = arith.constant 0 : index
    %c0_105 = arith.constant 0 : index
    %c0_106 = arith.constant 0 : index
    %207 = vector.load %arg5[%c0_103, %c0_104, %c0_105, %c0_106] : memref<1x8x3x126xf32, #tpu.memory_space<vmem>>, vector<1x1x3x126xf32>
    %208 = vector.shape_cast %207 : vector<1x1x3x126xf32> to vector<3x126xf32>
    %209 = vector.shape_cast %206 : vector<3x126xf32> to vector<1x1x3x126xf32>
    tpu.vector_store %arg5[%c0_103, %c0_104, %c0_105, %c0_106], %209 {strides = array<i32>} : memref<1x8x3x126xf32, #tpu.memory_space<vmem>>, vector<1x1x3x126xf32>,
    %c1_107 = arith.constant 1 : index
    %c0_108 = arith.constant 0 : index
    %210 = memref.load %arg4[%c1_107, %c0_108] : memref<8x4xf32, #tpu.memory_space<smem>>
    %211 = vector.broadcast %210 : f32 to vector<3x126xf32>
    %212 = arith.mulf %47, %211 : vector<3x126xf32>
    %c1_109 = arith.constant 1 : index
    %c1_110 = arith.constant 1 : index
    %213 = memref.load %arg4[%c1_109, %c1_110] : memref<8x4xf32, #tpu.memory_space<smem>>
    %214 = vector.broadcast %213 : f32 to vector<3x126xf32>
    %215 = arith.mulf %95, %214 : vector<3x126xf32>
    %216 = arith.addf %212, %215 : vector<3x126xf32>
    %c1_111 = arith.constant 1 : index
    %c2_112 = arith.constant 2 : index
    %217 = memref.load %arg4[%c1_111, %c2_112] : memref<8x4xf32, #tpu.memory_space<smem>>
    %218 = vector.broadcast %217 : f32 to vector<3x126xf32>
    %219 = arith.mulf %143, %218 : vector<3x126xf32>
    %220 = arith.addf %216, %219 : vector<3x126xf32>
    %c1_113 = arith.constant 1 : index
    %c3_114 = arith.constant 3 : index
    %221 = memref.load %arg4[%c1_113, %c3_114] : memref<8x4xf32, #tpu.memory_space<smem>>
    %222 = vector.broadcast %221 : f32 to vector<3x126xf32>
    %223 = arith.mulf %191, %222 : vector<3x126xf32>
    %224 = arith.addf %220, %223 : vector<3x126xf32>
    %c0_115 = arith.constant 0 : index
    %c1_116 = arith.constant 1 : index
    %c0_117 = arith.constant 0 : index
    %c0_118 = arith.constant 0 : index
    %225 = vector.load %arg5[%c0_115, %c1_116, %c0_117, %c0_118] : memref<1x8x3x126xf32, #tpu.memory_space<vmem>>, vector<1x1x3x126xf32>
    %226 = vector.shape_cast %225 : vector<1x1x3x126xf32> to vector<3x126xf32>
    %227 = vector.shape_cast %224 : vector<3x126xf32> to vector<1x1x3x126xf32>
    tpu.vector_store %arg5[%c0_115, %c1_116, %c0_117, %c0_118], %227 {strides = array<i32>} : memref<1x8x3x126xf32, #tpu.memory_space<vmem>>, vector<1x1x3x126xf32>,
    %c2_119 = arith.constant 2 : index
    %c0_120 = arith.constant 0 : index
    %228 = memref.load %arg4[%c2_119, %c0_120] : memref<8x4xf32, #tpu.memory_space<smem>>
    %229 = vector.broadcast %228 : f32 to vector<3x126xf32>
    %230 = arith.mulf %47, %229 : vector<3x126xf32>
    %c2_121 = arith.constant 2 : index
    %c1_122 = arith.constant 1 : index
    %231 = memref.load %arg4[%c2_121, %c1_122] : memref<8x4xf32, #tpu.memory_space<smem>>
    %232 = vector.broadcast %231 : f32 to vector<3x126xf32>
    %233 = arith.mulf %95, %232 : vector<3x126xf32>
    %234 = arith.addf %230, %233 : vector<3x126xf32>
    %c2_123 = arith.constant 2 : index
    %c2_124 = arith.constant 2 : index
    %235 = memref.load %arg4[%c2_123, %c2_124] : memref<8x4xf32, #tpu.memory_space<smem>>
    %236 = vector.broadcast %235 : f32 to vector<3x126xf32>
    %237 = arith.mulf %143, %236 : vector<3x126xf32>
    %238 = arith.addf %234, %237 : vector<3x126xf32>
    %c2_125 = arith.constant 2 : index
    %c3_126 = arith.constant 3 : index
    %239 = memref.load %arg4[%c2_125, %c3_126] : memref<8x4xf32, #tpu.memory_space<smem>>
    %240 = vector.broadcast %239 : f32 to vector<3x126xf32>
    %241 = arith.mulf %191, %240 : vector<3x126xf32>
    %242 = arith.addf %238, %241 : vector<3x126xf32>
    %c0_127 = arith.constant 0 : index
    %c2_128 = arith.constant 2 : index
    %c0_129 = arith.constant 0 : index
    %c0_130 = arith.constant 0 : index
    %243 = vector.load %arg5[%c0_127, %c2_128, %c0_129, %c0_130] : memref<1x8x3x126xf32, #tpu.memory_space<vmem>>, vector<1x1x3x126xf32>
    %244 = vector.shape_cast %243 : vector<1x1x3x126xf32> to vector<3x126xf32>
    %245 = vector.shape_cast %242 : vector<3x126xf32> to vector<1x1x3x126xf32>
    tpu.vector_store %arg5[%c0_127, %c2_128, %c0_129, %c0_130], %245 {strides = array<i32>} : memref<1x8x3x126xf32, #tpu.memory_space<vmem>>, vector<1x1x3x126xf32>,
    %c3_131 = arith.constant 3 : index
    %c0_132 = arith.constant 0 : index
    %246 = memref.load %arg4[%c3_131, %c0_132] : memref<8x4xf32, #tpu.memory_space<smem>>
    %247 = vector.broadcast %246 : f32 to vector<3x126xf32>
    %248 = arith.mulf %47, %247 : vector<3x126xf32>
    %c3_133 = arith.constant 3 : index
    %c1_134 = arith.constant 1 : index
    %249 = memref.load %arg4[%c3_133, %c1_134] : memref<8x4xf32, #tpu.memory_space<smem>>
    %250 = vector.broadcast %249 : f32 to vector<3x126xf32>
    %251 = arith.mulf %95, %250 : vector<3x126xf32>
    %252 = arith.addf %248, %251 : vector<3x126xf32>
    %c3_135 = arith.constant 3 : index
    %c2_136 = arith.constant 2 : index
    %253 = memref.load %arg4[%c3_135, %c2_136] : memref<8x4xf32, #tpu.memory_space<smem>>
    %254 = vector.broadcast %253 : f32 to vector<3x126xf32>
    %255 = arith.mulf %143, %254 : vector<3x126xf32>
    %256 = arith.addf %252, %255 : vector<3x126xf32>
    %c3_137 = arith.constant 3 : index
    %c3_138 = arith.constant 3 : index
    %257 = memref.load %arg4[%c3_137, %c3_138] : memref<8x4xf32, #tpu.memory_space<smem>>
    %258 = vector.broadcast %257 : f32 to vector<3x126xf32>
    %259 = arith.mulf %191, %258 : vector<3x126xf32>
    %260 = arith.addf %256, %259 : vector<3x126xf32>
    %c0_139 = arith.constant 0 : index
    %c3_140 = arith.constant 3 : index
    %c0_141 = arith.constant 0 : index
    %c0_142 = arith.constant 0 : index
    %261 = vector.load %arg5[%c0_139, %c3_140, %c0_141, %c0_142] : memref<1x8x3x126xf32, #tpu.memory_space<vmem>>, vector<1x1x3x126xf32>
    %262 = vector.shape_cast %261 : vector<1x1x3x126xf32> to vector<3x126xf32>
    %263 = vector.shape_cast %260 : vector<3x126xf32> to vector<1x1x3x126xf32>
    tpu.vector_store %arg5[%c0_139, %c3_140, %c0_141, %c0_142], %263 {strides = array<i32>} : memref<1x8x3x126xf32, #tpu.memory_space<vmem>>, vector<1x1x3x126xf32>,
    %c4_143 = arith.constant 4 : index
    %c0_144 = arith.constant 0 : index
    %264 = memref.load %arg4[%c4_143, %c0_144] : memref<8x4xf32, #tpu.memory_space<smem>>
    %265 = vector.broadcast %264 : f32 to vector<3x126xf32>
    %266 = arith.mulf %47, %265 : vector<3x126xf32>
    %c4_145 = arith.constant 4 : index
    %c1_146 = arith.constant 1 : index
    %267 = memref.load %arg4[%c4_145, %c1_146] : memref<8x4xf32, #tpu.memory_space<smem>>
    %268 = vector.broadcast %267 : f32 to vector<3x126xf32>
    %269 = arith.mulf %95, %268 : vector<3x126xf32>
    %270 = arith.addf %266, %269 : vector<3x126xf32>
    %c4_147 = arith.constant 4 : index
    %c2_148 = arith.constant 2 : index
    %271 = memref.load %arg4[%c4_147, %c2_148] : memref<8x4xf32, #tpu.memory_space<smem>>
    %272 = vector.broadcast %271 : f32 to vector<3x126xf32>
    %273 = arith.mulf %143, %272 : vector<3x126xf32>
    %274 = arith.addf %270, %273 : vector<3x126xf32>
    %c4_149 = arith.constant 4 : index
    %c3_150 = arith.constant 3 : index
    %275 = memref.load %arg4[%c4_149, %c3_150] : memref<8x4xf32, #tpu.memory_space<smem>>
    %276 = vector.broadcast %275 : f32 to vector<3x126xf32>
    %277 = arith.mulf %191, %276 : vector<3x126xf32>
    %278 = arith.addf %274, %277 : vector<3x126xf32>
    %c0_151 = arith.constant 0 : index
    %c4_152 = arith.constant 4 : index
    %c0_153 = arith.constant 0 : index
    %c0_154 = arith.constant 0 : index
    %279 = vector.load %arg5[%c0_151, %c4_152, %c0_153, %c0_154] : memref<1x8x3x126xf32, #tpu.memory_space<vmem>>, vector<1x1x3x126xf32>
    %280 = vector.shape_cast %279 : vector<1x1x3x126xf32> to vector<3x126xf32>
    %281 = vector.shape_cast %278 : vector<3x126xf32> to vector<1x1x3x126xf32>
    tpu.vector_store %arg5[%c0_151, %c4_152, %c0_153, %c0_154], %281 {strides = array<i32>} : memref<1x8x3x126xf32, #tpu.memory_space<vmem>>, vector<1x1x3x126xf32>,
    %c5_155 = arith.constant 5 : index
    %c0_156 = arith.constant 0 : index
    %282 = memref.load %arg4[%c5_155, %c0_156] : memref<8x4xf32, #tpu.memory_space<smem>>
    %283 = vector.broadcast %282 : f32 to vector<3x126xf32>
    %284 = arith.mulf %47, %283 : vector<3x126xf32>
    %c5_157 = arith.constant 5 : index
    %c1_158 = arith.constant 1 : index
    %285 = memref.load %arg4[%c5_157, %c1_158] : memref<8x4xf32, #tpu.memory_space<smem>>
    %286 = vector.broadcast %285 : f32 to vector<3x126xf32>
    %287 = arith.mulf %95, %286 : vector<3x126xf32>
    %288 = arith.addf %284, %287 : vector<3x126xf32>
    %c5_159 = arith.constant 5 : index
    %c2_160 = arith.constant 2 : index
    %289 = memref.load %arg4[%c5_159, %c2_160] : memref<8x4xf32, #tpu.memory_space<smem>>
    %290 = vector.broadcast %289 : f32 to vector<3x126xf32>
    %291 = arith.mulf %143, %290 : vector<3x126xf32>
    %292 = arith.addf %288, %291 : vector<3x126xf32>
    %c5_161 = arith.constant 5 : index
    %c3_162 = arith.constant 3 : index
    %293 = memref.load %arg4[%c5_161, %c3_162] : memref<8x4xf32, #tpu.memory_space<smem>>
    %294 = vector.broadcast %293 : f32 to vector<3x126xf32>
    %295 = arith.mulf %191, %294 : vector<3x126xf32>
    %296 = arith.addf %292, %295 : vector<3x126xf32>
    %c0_163 = arith.constant 0 : index
    %c5_164 = arith.constant 5 : index
    %c0_165 = arith.constant 0 : index
    %c0_166 = arith.constant 0 : index
    %297 = vector.load %arg5[%c0_163, %c5_164, %c0_165, %c0_166] : memref<1x8x3x126xf32, #tpu.memory_space<vmem>>, vector<1x1x3x126xf32>
    %298 = vector.shape_cast %297 : vector<1x1x3x126xf32> to vector<3x126xf32>
    %299 = vector.shape_cast %296 : vector<3x126xf32> to vector<1x1x3x126xf32>
    tpu.vector_store %arg5[%c0_163, %c5_164, %c0_165, %c0_166], %299 {strides = array<i32>} : memref<1x8x3x126xf32, #tpu.memory_space<vmem>>, vector<1x1x3x126xf32>,
    %c6_167 = arith.constant 6 : index
    %c0_168 = arith.constant 0 : index
    %300 = memref.load %arg4[%c6_167, %c0_168] : memref<8x4xf32, #tpu.memory_space<smem>>
    %301 = vector.broadcast %300 : f32 to vector<3x126xf32>
    %302 = arith.mulf %47, %301 : vector<3x126xf32>
    %c6_169 = arith.constant 6 : index
    %c1_170 = arith.constant 1 : index
    %303 = memref.load %arg4[%c6_169, %c1_170] : memref<8x4xf32, #tpu.memory_space<smem>>
    %304 = vector.broadcast %303 : f32 to vector<3x126xf32>
    %305 = arith.mulf %95, %304 : vector<3x126xf32>
    %306 = arith.addf %302, %305 : vector<3x126xf32>
    %c6_171 = arith.constant 6 : index
    %c2_172 = arith.constant 2 : index
    %307 = memref.load %arg4[%c6_171, %c2_172] : memref<8x4xf32, #tpu.memory_space<smem>>
    %308 = vector.broadcast %307 : f32 to vector<3x126xf32>
    %309 = arith.mulf %143, %308 : vector<3x126xf32>
    %310 = arith.addf %306, %309 : vector<3x126xf32>
    %c6_173 = arith.constant 6 : index
    %c3_174 = arith.constant 3 : index
    %311 = memref.load %arg4[%c6_173, %c3_174] : memref<8x4xf32, #tpu.memory_space<smem>>
    %312 = vector.broadcast %311 : f32 to vector<3x126xf32>
    %313 = arith.mulf %191, %312 : vector<3x126xf32>
    %314 = arith.addf %310, %313 : vector<3x126xf32>
    %c0_175 = arith.constant 0 : index
    %c6_176 = arith.constant 6 : index
    %c0_177 = arith.constant 0 : index
    %c0_178 = arith.constant 0 : index
    %315 = vector.load %arg5[%c0_175, %c6_176, %c0_177, %c0_178] : memref<1x8x3x126xf32, #tpu.memory_space<vmem>>, vector<1x1x3x126xf32>
    %316 = vector.shape_cast %315 : vector<1x1x3x126xf32> to vector<3x126xf32>
    %317 = vector.shape_cast %314 : vector<3x126xf32> to vector<1x1x3x126xf32>
    tpu.vector_store %arg5[%c0_175, %c6_176, %c0_177, %c0_178], %317 {strides = array<i32>} : memref<1x8x3x126xf32, #tpu.memory_space<vmem>>, vector<1x1x3x126xf32>,
    %c7_179 = arith.constant 7 : index
    %c0_180 = arith.constant 0 : index
    %318 = memref.load %arg4[%c7_179, %c0_180] : memref<8x4xf32, #tpu.memory_space<smem>>
    %319 = vector.broadcast %318 : f32 to vector<3x126xf32>
    %320 = arith.mulf %47, %319 : vector<3x126xf32>
    %c7_181 = arith.constant 7 : index
    %c1_182 = arith.constant 1 : index
    %321 = memref.load %arg4[%c7_181, %c1_182] : memref<8x4xf32, #tpu.memory_space<smem>>
    %322 = vector.broadcast %321 : f32 to vector<3x126xf32>
    %323 = arith.mulf %95, %322 : vector<3x126xf32>
    %324 = arith.addf %320, %323 : vector<3x126xf32>
    %c7_183 = arith.constant 7 : index
    %c2_184 = arith.constant 2 : index
    %325 = memref.load %arg4[%c7_183, %c2_184] : memref<8x4xf32, #tpu.memory_space<smem>>
    %326 = vector.broadcast %325 : f32 to vector<3x126xf32>
    %327 = arith.mulf %143, %326 : vector<3x126xf32>
    %328 = arith.addf %324, %327 : vector<3x126xf32>
    %c7_185 = arith.constant 7 : index
    %c3_186 = arith.constant 3 : index
    %329 = memref.load %arg4[%c7_185, %c3_186] : memref<8x4xf32, #tpu.memory_space<smem>>
    %330 = vector.broadcast %329 : f32 to vector<3x126xf32>
    %331 = arith.mulf %191, %330 : vector<3x126xf32>
    %332 = arith.addf %328, %331 : vector<3x126xf32>
    %c0_187 = arith.constant 0 : index
    %c7_188 = arith.constant 7 : index
    %c0_189 = arith.constant 0 : index
    %c0_190 = arith.constant 0 : index
    %333 = vector.load %arg5[%c0_187, %c7_188, %c0_189, %c0_190] : memref<1x8x3x126xf32, #tpu.memory_space<vmem>>, vector<1x1x3x126xf32>
    %334 = vector.shape_cast %333 : vector<1x1x3x126xf32> to vector<3x126xf32>
    %335 = vector.shape_cast %332 : vector<3x126xf32> to vector<1x1x3x126xf32>
    tpu.vector_store %arg5[%c0_187, %c7_188, %c0_189, %c0_190], %335 {strides = array<i32>} : memref<1x8x3x126xf32, #tpu.memory_space<vmem>>, vector<1x1x3x126xf32>,
    return
  }
  func.func @transform_0(%arg0: i32, %arg1: i32) -> (i32, i32, i32, i32) {
    %c0_i32 = arith.constant 0 : i32
    %c0_i32_0 = arith.constant 0 : i32
    %c0_i32_1 = arith.constant 0 : i32
    return %arg0, %c0_i32, %arg1, %c0_i32_0 : i32, i32, i32, i32
  }
  func.func @transform_1(%arg0: i32, %arg1: i32) -> (i32, i32) {
    %c0_i32 = arith.constant 0 : i32
    %c0_i32_0 = arith.constant 0 : i32
    %c0_i32_1 = arith.constant 0 : i32
    return %c0_i32, %c0_i32_0 : i32, i32
  }
  func.func @transform_2(%arg0: i32, %arg1: i32) -> (i32, i32) {
    %c0_i32 = arith.constant 0 : i32
    %c0_i32_0 = arith.constant 0 : i32
    %c0_i32_1 = arith.constant 0 : i32
    return %c0_i32, %c0_i32_0 : i32, i32
  }
  func.func @transform_3(%arg0: i32, %arg1: i32) -> (i32, i32, i32, i32) {
    %c0_i32 = arith.constant 0 : i32
    %c0_i32_0 = arith.constant 0 : i32
    %c0_i32_1 = arith.constant 0 : i32
    return %arg0, %c0_i32, %arg1, %c0_i32_0 : i32, i32, i32, i32
  }
}

</mosaic_0001>

<bundles_post_ra>
// kernel: tpu_custom_call.1
= control target key start
LH: loop header
LB: loop body
LE: loop exit
PB: predicated region body
PF: predicated region fallthrough
CT: control target
= control target key end

     0   :  { %8 = vsyncpa [#allocation3], 0  ;;  %s1849_s0 = inlined_call_operand.hbm [shape: f32[2,4,4,126], index: 0, kind: input, shape index: {}]   ;;  %s1850_s1 = inlined_call_operand.vmem [shape: f32[4,9], index: 1, kind: input, shape index: {}]   ;;  %s1851_s2 = inlined_call_operand.vmem [shape: f32[8,4], index: 2, kind: input, shape index: {}]   ;;  %s1852_s3 = inlined_call_operand.vmem [shape: f32[2,8,3,126], index: 3, kind: output, shape index: {}]  }
   0x1   :  { %10 = vsyncpa [#allocation3 + $0x1], 0 }
   0x2   :  { %11 = vsyncpa [#allocation4], 0 }
   0x3   :  { %12 = vsyncpa [#allocation7], 0  ;;  %s1251_s12 = smov 0   ;;  %s1253_s13 = smov 0  }
   0x4   :  { %s1255_s14 = smov 0   ;;  %s1257_s15 = smov 0  }
   0x5   :  { %s1259_s16 = smov 0   ;;  %s1261_s17 = smov 0  }
   0x6 LB: > { %s916_s18 = sadd.s32 4294967295, %s1216_s17   ;;  %s39_s19 = sadd.s32 1, %s1204_s14  ;;  %s1216_s17 = sphi %s1261_s17, %s18_s17   ;;  %s1212_s16 = sphi %s1259_s16, %s1877_s16   ;;  %s1208_s15 = sphi %s1257_s15, %s1876_s15   ;;  %s1204_s14 = sphi %s1255_s14, %s1875_s14   ;;  %s1200_s13 = sphi %s1253_s13, %s1874_s13   ;;  %s1196_s12 = sphi %s1251_s12, %s1873_s12  }
   0x7   : > { %p46_p0 = scmp.ne.s32.totalorder %s1204_s14, %s1200_s13  ;;  %p47_p1 = scmp.eq.s32.totalorder %s1216_s17, 0 }
   0x8   : > { %p52_p2 = scmp.ne.s32.totalorder %s1200_s13, %s1196_s12  ;;  %p1285_p3 = scmp.eq.s32.totalorder %s916_s18, 0 }
   0x9   : > { %p48_p4 = por %p47_p1, %p46_p0  ;;  %p918_p5 = scmp.ge.s32.totalorder %s1216_s17, 1 }
   0xa   : > { %s1862_s20 = scalar_select %p1285_p3, 1, 0 }
   0xb   : > { %p1292_p6 = por %p1285_p3, %p52_p2  ;;  %p133_p7 = scmp.lt.s32.totalorder %s1216_s17, 3 }
   0xc   : > { %s146_s24 = sshll.u32 %s1850_s1, 4  ;;  %p1037_p10 = scmp.lt.s32.totalorder %s1216_s17, 2  ;;  %s147_s24 = int_to_ptr.vmem [resolvable:$true] %s146_s24 }
   0xd   : > { %s1863_s21 = scalar_select %p1292_p6, 1, 0 }
   0xe   : > { %p1300_p8 = pnand %p918_p5, %p133_p7  ;;  %s157_s28 = sshll.u32 %s1851_s2, 4  ;;  %s158_s28 = int_to_ptr.vmem [resolvable:$true] %s157_s28 }
   0xf   : > { %p1316_p12 = pnand %p1037_p10, %p48_p4  ;;  %s1100_s4 = scalar_lea.vmem %s147_s24, 64 }
  0x10   : > { %s1864_s25 = scalar_select %p1300_p8, 1, 0 }
  0x11   : > { %p1024_p9 = pneg %p1300_p8  ;;  %p1101_p13 = scmp.ne.s32.totalorder %s147_s24, %s1100_s4 }
  0x12   : > { %s1866_s30 = scalar_select %p1316_p12, 1, 0 }
  0x13   : > { %p1312_p11 = pnand %p1024_p9, %p1285_p3  ;;  %p1108_p5 = scmp.lt.s32.totalorder %s147_s24, %s147_s24 }
  0x14   : > { %p1109_p7 = scmp.lt.s32.totalorder %s1100_s4, %s1100_s4 }
  0x15   : > { %p1102_p0 = pneg %p1312_p11 }
  0x16   : > { %p1110_p6 = por %p1109_p7, %p1108_p5 }
  0x17   : > { %p1103_p1 = pnand %p1102_p0, %p1101_p13 }
  0x19   : > { %p1104_p2 = pneg %p1103_p1 }
  0x1b   : > { %p1111_p8 = pnand %p1110_p6, %p1104_p2 }
  0x1d   : > { %1114 = shalt.err (!%p1111_p8)
}
  0x1e   : > { %s1218_s5 = smov [#allocation5]   ;;  %s1115_s6 = scalar_lea.vmem %s158_s28, 128 }
  0x1f   : > { %1027 = dma.vmem_to_smem (!%p1312_p11), %s147_s24, 64, %s1218_s5, [#allocation4]  }
  0x20   : > { %p1116_p4 = scmp.ne.s32.totalorder %s158_s28, %s1115_s6  ;;  %p1123_p3 = scmp.lt.s32.totalorder %s158_s28, %s158_s28 }
  0x21   : > { %p1124_p12 = scmp.lt.s32.totalorder %s1115_s6, %s1115_s6 }
  0x22   : > { %p1118_p9 = pnand %p1116_p4, %p1102_p0 }
  0x23   : > { %p1125_p13 = por %p1124_p12, %p1123_p3 }
  0x24   : > { %p1119_p10 = pneg %p1118_p9 }
  0x26   : > { %p1126_p1 = pnand %p1125_p13, %p1119_p10 }
  0x28   : > { %1129 = shalt.err (!%p1126_p1)
}
  0x29   : > { %s1219_s7 = smov [#allocation6]   ;;  %s168_s8 = sand.u32 1, %s1204_s14  }
  0x2a   : > { %1030 = dma.vmem_to_smem (!%p1312_p11), %s158_s28, 128, %s1219_s7, [#allocation7]  }
  0x2b   : > { %s30_s9 = sadd.s32 1, %s1212_s16  ;;  %s922_s10 = sshll.u32 %s168_s8, 4 }
  0x2c   : > { %p32_p6 = scmp.ge.s32.totalorder %s30_s9, 2  ;;  %s1012_s11 = sshll.u32 %s1212_s16, 8 }
  0x2d   : > { %s179_s22 = scalar_lea.hbm %s1849_s0, %s1012_s11  ;;  %s172_s23 = scalar_lea.vmem [#allocation2], %s922_s10 }
  0x2e   : > { %s1879_s9 = smov (%p32_p6, %s30_s9), 0  ;;  %s180_s24 = sshll.u32 %s172_s23, 4  ;;  %s181_s24 = int_to_ptr.vmem [resolvable:$true] %s180_s24 }
  0x2f   : > { %s34_s26 = ssub.s32 %s1212_s16, %s1879_s9  ;;  %s169_s28 = scalar_lea.sflag [#allocation3], %s168_s8 }
  0x30   : > { %p37_p3 = scmp.eq.s32.totalorder %s34_s26, 0  ;;  %p1867_p8 = scmp.ne.s32.totalorder %s1866_s30, 0 }
  0x31   : > { %s1143_s29 = scalar_lea.vmem %s181_s24, 256  ;;  %s1220_s4 = smov [#allocation2]  }
  0x32   : > { %s1339_s27 = scalar_select %p37_p3, %s1204_s14, %s39_s19  }
  0x33   : > { %p1132_p11 = pneg %p1867_p8  ;;  %p1144_p12 = scmp.ne.s32.totalorder %s181_s24, %s1143_s29 }
  0x34   : > { %s1148_s5 = sshll.u32 %s1220_s4, 4  ;;  %s1149_s5 = int_to_ptr.vmem [resolvable:$false] %s1148_s5 }
  0x35   : > { %p1146_p0 = pnand %p1144_p12, %p1132_p11  ;;  %s1150_s6 = scalar_lea.vmem %s1149_s5, 512 }
  0x36   : > { %p1151_p5 = scmp.lt.s32.totalorder %s181_s24, %s1149_s5  ;;  %p1152_p7 = scmp.lt.s32.totalorder %s1150_s6, %s1143_s29 }
  0x37   : > { %p1147_p2 = pneg %p1146_p0 }
  0x38   : > { %p1153_p4 = por %p1152_p7, %p1151_p5 }
  0x3a   : > { %p1154_p9 = pnand %p1153_p4, %p1147_p2 }
  0x3c   : > { %1157 = shalt.err (!%p1154_p9)
}
  0x3d   : > { %s1221_s7 = smov 64   ;;  %s1222_s19 = smov 4  }
  0x3e   : > { %1034 = dma.hbm_to_vmem [thread:$0]  (!%p1867_p8), %s179_s22, 256, %s181_s24, %s169_s28, %s1221_s7, %s1221_s7, %s1222_s19  }
  0x3f   : > { %p1868_p10 = scmp.ne.s32.totalorder %s1864_s25, 0 }
  0x40   : > { %s194_s8 = sand.u32 (!%p1868_p10), 1, %s1200_s13   ;;  %p1869_p13 = scmp.ne.s32.totalorder (!%p1868_p10), %s1863_s21, 0 }
  0x41   : > { %192 = sbr.rel (%p1868_p10) target bundleno = 436 (0x1b4), region = 32  ;;  %s926_s10 = sshll.u32 (!%p1868_p10), %s194_s8, 4 }
  0x42   : > { %s195_s11 = scalar_lea.sflag (!%p1868_p10), [#allocation3], %s194_s8  ;;  %s1348_s12 = scalar_lea.vmem (!%p1868_p10), [#allocation2], %s926_s10 }
  0x46   : > { %1183 = dma.done.wait (%p1869_p13), %s195_s11, 256  }
  0x47   : > { %1185 = vsyncadd (%p1869_p13), %s195_s11, 4294967040  ;;  %p1870_p1 = scmp.ne.s32.totalorder %s1862_s20, 0 }
  0x49   : > { %1187 = dma.done.wait (%p1870_p1), [#allocation4], 64  }
  0x4a   : > { %1189 = vsyncadd (%p1870_p1), [#allocation4], 4294967232 }
  0x4b   : > { %1191 = dma.done.wait (%p1870_p1), [#allocation7], 128  }
  0x4c   : > { %1193 = vsyncadd (%p1870_p1), [#allocation7], 4294967168 }
  0x4d   : > { %211 = sfence }
  0x4e   : > { %v245_v0 = vld [vmem:[%s1348_s12 + $0x1] sm:$0x7]  ;;  %s1858_s21 = smov 126   ;;  %v952_v1 = vld [vmem:[%s1348_s12 + $0x9] sm:$0x7]  ;;  %s1370_s20 = sld [smem:[#allocation5 + $0x3]] }
  0x4f   : > { %247 = vrot.lane.b32.xlu0 %v245_v0, %s1858_s21  ;;  %v941_v2 = vld [vmem:[%s1348_s12 + $0x5] sm:$0x7]  ;;  %464 = vrot.lane.b32.xlu1 %v952_v1, %s1858_s21  ;;  %v963_v3 = vld [vmem:[%s1348_s12 + $0xd] sm:$0x7]  ;;  %s1372_s25 = sld [smem:[#allocation5 + $0x4]]  ;;  %s1860_s26 = smov 110  }
  0x50   : > { %s1374_s30 = sld [smem:[#allocation5 + $0x83]]  ;;  %s1225_s4 = smov 109   ;;  %vm250_vm0 = vcmask 1031168   ;;  %v1409_v19 = vld [vmem:[%s1348_s12] sm:$0x7]  ;;  %vm278_vm1 = vcmask 900096  }
  0x51   : > { %s1376_s18 = sld [smem:[#allocation5 + $0x5]]  ;;  %s1226_s6 = smov 108   ;;  %v1474_v44 = vld [vmem:[%s1348_s12 + $0x4] sm:$0x7]  ;;  %v1489_v50 = vld [vmem:[%s1348_s12 + $0x8] sm:$0x7] }
  0x52   : > { %s1379_s22 = sld [smem:[#allocation5 + $0x84]]  ;;  %s1227_s19 = smov 92   ;;  %v1504_v56 = vld [vmem:[%s1348_s12 + $0xc] sm:$0x7]  ;;  %vm292_vm2 = vcmask 891904   ;;  %vm306_vm3 = vcmask 883712  }
  0x53   : > { %359 = vrot.lane.b32.xlu0 %v941_v2, %s1858_s21  ;;  %569 = vrot.lane.b32.xlu1 %v963_v3, %s1858_s21  ;;  %s1381_s23 = sld [smem:[#allocation5 + $0x103]]  ;;  %s1228_s10 = smov 91   ;;  %vm320_vm4 = vcmask 752640   ;;  %vm334_vm5 = vcmask 744448   ;;  %vm348_vm6 = vcmask 736256   ;;  %vm682_vm7 = vcmask 1026048  }
  0x54   : > { %v269_v4 = vstv %s1370_s20  ;;  %s1385_s24 = sld [smem:[#allocation5 + $0x6]]  ;;  %s1229_s11 = smov 127  }
  0x55   : > { %v283_v7 = vstv %s1372_s25  ;;  %s1393_s28 = sld [smem:[#allocation5 + $0x7]]  ;;  %s1230_s25 = smov 90  }
  0x56   : > { %v380_v8 = vstv %s1374_s30  ;;  %s931_s29 = sld [smem:[#allocation5 + $0x1]]  ;;  %p233_p6 = scmp.lt.s32.totalorder %s1208_s15, 1 }
  0x57   : > { %v297_v12 = vstv %s1376_s18  ;;  %s1406_s5 = sld [smem:[#allocation5 + $0x8]] }
  0x58   : > { %v393_v13 = vstv %s1379_s22  ;;  %s1421_s7 = sld [smem:[#allocation5 + $0x85]]  ;;  %s1881_s15 = smov (!%p233_p6, %s1208_s15), 1 }
  0x59   : > { %v485_v15 = vstv %s1381_s23  ;;  %s1427_s8 = sld [smem:[#allocation5 + $0x104]] }
  0x5a   : > { %v311_v18 = vstv %s1385_s24  ;;  %s1431_s20 = sld [smem:[#allocation5 + $0x183]] }
  0x5b   : > { %v325_v23 = vstv %s1393_s28  ;;  %s1442_s18 = sld [smem:[#allocation5 + $0x86]] }
  0x5c   : > { %v253_v24 = vstv %s931_s29  ;;  %s1453_s24 = sld [smem:[#allocation5 + $0x105]] }
  0x5d   : > { %v339_v27 = vstv %s1406_s5  ;;  %s942_s28 = sld [smem:[#allocation5 + $0x81]] }
  0x5e   : > { %v406_v30 = vstv %s1421_s7  ;;  %s1462_s29 = sld [smem:[#allocation5 + $0x184]] }
  0x5f   : > { %v498_v33 = vstv %s1427_s8  ;;  %s1470_s5 = sld [smem:[#allocation5 + $0x87]] }
  0x60   : > { %v590_v35 = vstv %s1431_s20  ;;  %s953_s21 = sld [smem:[#allocation5 + $0x101]]  ;;  %s1872_s20 = smov 126  }
  0x61   : > { %v419_v40 = vstv %s1442_s18  ;;  %s1523_s12 = sld [smem:[#allocation5 + $0x107]] }
  0x62   : > { %v511_v43 = vstv %s1453_s24  ;;  %s964_s24 = sld [smem:[#allocation5 + $0x181]] }
  0x63   : > { %v364_v49 = vstv %s942_s28  ;;  %s1501_s28 = sld [smem:[#allocation5 + $0x185]] }
  0x64   : > { %v603_v48 = vstv %s1462_s29  ;;  %s943_s7 = sld [smem:[#allocation5 + $0x82]]  ;;  %s1871_s29 = smov 110  }
  0x65   : > { %v432_v54 = vstv %s1470_s5  ;;  %s954_s8 = sld [smem:[#allocation5 + $0x102]] }
  0x66   : > { %v469_v55 = vstv %s953_s21  ;;  %s1516_s21 = sld [smem:[#allocation5 + $0x88]] }
  0x67   : > { %s965_s18 = sld [smem:[#allocation5 + $0x182]] }
  0x68   : > { %v574_v61 = vstv %s964_s24  ;;  %s960_s30 = sld [smem:[#allocation5 + $0x108]] }
  0x69   : > { %v616_v0 = vstv %s1501_s28  ;;  %s970_s5 = sld [smem:[#allocation5 + $0x187]] }
  0x6a   : > { %s971_s22 = sld [smem:[#allocation5 + $0x188]] }
  0x6b   : > { %s242_s23 = sld [smem:[#allocation5]] }
  0x6c   : > { %v445_v3 = vstv %s1516_s21  ;;  %s1663_s24 = sld [smem:[#allocation6 + $0x100]] }
  0x6d   : > { %s1665_s28 = sld [smem:[#allocation6 + $0x180]] }
  0x6e   : > { %s1667_s21 = sld [smem:[#allocation6 + $0x200]] }
  0xc1   : > { %v248_v5 = vpop.permute.xlu0 %247  ;;  %v1399_v14 = vpop.permute.xlu1 %464 }
  0xc2   : > { %v271_v6 = vmul.f32 %v269_v4, %v248_v5  ;;  %v285_v10 = vmul.f32 %v283_v7, %v248_v5  ;;  %v299_v16 = vmul.f32 %v297_v12, %v248_v5  ;;  %v487_v20 = vmul.f32 %v485_v15, %v1399_v14 }
  0xc3   : > { %v313_v21 = vmul.f32 %v311_v18, %v248_v5  ;;  %v1418_v22 = vsel %vm250_vm0, %v1409_v19, %v248_v5  ;;  %v327_v25 = vmul.f32 %v325_v23, %v248_v5  ;;  %v341_v28 = vmul.f32 %v339_v27, %v248_v5 }
  0xc4   : > { %276 = vrot.lane.b32.xlu1 %v271_v6, %s1860_s26  ;;  %v254_v26 = vmul.f32 %v253_v24, %v1418_v22  ;;  %v270_v29 = vmul.f32 %v269_v4, %v1418_v22  ;;  %v284_v32 = vmul.f32 %v283_v7, %v1418_v22  ;;  %v500_v36 = vmul.f32 %v498_v33, %v1399_v14 }
  0xc5   : > { %v1388_v9 = vpop.permute.xlu0 %359  ;;  %v1446_v34 = vpop.permute.xlu1 %569  ;;  %v298_v37 = vmul.f32 %v297_v12, %v1418_v22  ;;  %v312_v39 = vmul.f32 %v311_v18, %v1418_v22  ;;  %v326_v42 = vmul.f32 %v325_v23, %v1418_v22  ;;  %v513_v45 = vmul.f32 %v511_v43, %v1399_v14 }
  0xc6   : > { %v382_v11 = vmul.f32 %v380_v8, %v1388_v9  ;;  %v395_v17 = vmul.f32 %v393_v13, %v1388_v9  ;;  %v408_v31 = vmul.f32 %v406_v30, %v1388_v9  ;;  %v592_v38 = vmul.f32 %v590_v35, %v1446_v34 }
  0xc7   : > { %v421_v41 = vmul.f32 %v419_v40, %v1388_v9  ;;  %v340_v46 = vmul.f32 %v339_v27, %v1418_v22  ;;  %v1485_v47 = vsel %vm250_vm0, %v1474_v44, %v1388_v9  ;;  %v605_v51 = vmul.f32 %v603_v48, %v1446_v34 }
  0xc8   : > { %290 = vrot.lane.b32.xlu1 %v285_v10, %s1225_s4  ;;  %387 = vrot.lane.b32.xlu0 %v382_v11, %s1860_s26  ;;  %v365_v52 = vmul.f32 %v364_v49, %v1485_v47  ;;  %v1498_v53 = vsel %vm250_vm0, %v1489_v50, %v1399_v14  ;;  %v434_v57 = vmul.f32 %v432_v54, %v1388_v9  ;;  %v537_v6 = vstv %s1523_s12  ;;  %s1669_s12 = sld [smem:[#allocation6 + $0x280]] }
  0xc9   : > { %v470_v58 = vmul.f32 %v469_v55, %v1498_v53  ;;  %v1513_v59 = vsel %vm250_vm0, %v1504_v56, %v1446_v34  ;;  %v618_v1 = vmul.f32 %v616_v0, %v1446_v34  ;;  %v407_v2 = vmul.f32 %v406_v30, %v1485_v47 }
  0xca   : > { %v575_v63 = vmul.f32 %v574_v61, %v1513_v59  ;;  %v447_v4 = vmul.f32 %v445_v3, %v1388_v9  ;;  %v499_v5 = vmul.f32 %v498_v33, %v1498_v53  ;;  %v539_v7 = vmul.f32 %v537_v6, %v1399_v14 }
  0xcb   : > { %v591_v10 = vmul.f32 %v590_v35, %v1513_v59  ;;  %v420_v12 = vmul.f32 %v419_v40, %v1485_v47  ;;  %v512_v18 = vmul.f32 %v511_v43, %v1498_v53  ;;  %v604_v23 = vmul.f32 %v603_v48, %v1513_v59 }
  0xcc   : > { %304 = vrot.lane.b32.xlu1 %v299_v16, %s1226_s6  ;;  %400 = vrot.lane.b32.xlu0 %v395_v17, %s1225_s4  ;;  %v433_v24 = vmul.f32 %v432_v54, %v1485_v47  ;;  %v446_v30 = vmul.f32 %v445_v3, %v1485_v47  ;;  %v550_v33 = vstv %s960_s30  ;;  %v243_v48 = vstv %s242_s23  ;;  %s1689_s30 = sld [smem:[#allocation6 + $0x301]] }
  0xcd   : > { %s1731_s23 = sld [smem:[#allocation6 + $0x2]] }
  0xd0   : > { %318 = vrot.lane.b32.xlu1 %v313_v21, %s1227_s19  ;;  %492 = vrot.lane.b32.xlu0 %v487_v20, %s1860_s26  ;;  %v372_v20 = vstv %s943_s7  ;;  %s1677_s7 = sld [smem:[#allocation6 + $0x81]] }
  0xd1   : > { %v373_v21 = vmul.f32 %v372_v20, %v1485_v47 }
  0xd4   : > { %332 = vrot.lane.b32.xlu1 %v327_v25, %s1228_s10  ;;  %256 = vrot.lane.b32.xlu0 %v254_v26, %s1229_s11  ;;  %v477_v25 = vstv %s954_s8  ;;  %s1682_s8 = sld [smem:[#allocation6 + $0x181]] }
  0xd5   : > { %v478_v26 = vmul.f32 %v477_v25, %v1498_v53 }
  0xd8   : > { %346 = vrot.lane.b32.xlu1 %v341_v28, %s1230_s25  ;;  %274 = vrot.lane.b32.xlu0 %v270_v29, %s1860_s26  ;;  %v394_v28 = vmul.f32 %v393_v13, %v1485_v47  ;;  %v486_v29 = vmul.f32 %v485_v15, %v1498_v53  ;;  %v552_v15 = vmul.f32 %v550_v33, %v1399_v14 }
  0xdc   : > { %413 = vrot.lane.b32.xlu1 %v408_v31, %s1226_s6  ;;  %288 = vrot.lane.b32.xlu0 %v284_v32, %s1225_s4  ;;  %v582_v31 = vstv %s965_s18  ;;  %v538_v32 = vmul.f32 %v537_v6, %v1498_v53  ;;  %s1686_s18 = sld [smem:[#allocation6 + $0x281]] }
  0xdd   : > { %v583_v13 = vmul.f32 %v582_v31, %v1513_v59 }
  0xe0   : > { %505 = vrot.lane.b32.xlu1 %v500_v36, %s1225_s4  ;;  %302 = vrot.lane.b32.xlu0 %v298_v37, %s1226_s6  ;;  %v642_v36 = vstv %s970_s5  ;;  %s1692_s5 = sld [smem:[#allocation6 + $0x380]] }
  0xe1   : > { %v644_v37 = vmul.f32 %v642_v36, %v1446_v34 }
  0xe4   : > { %597 = vrot.lane.b32.xlu1 %v592_v38, %s1860_s26  ;;  %316 = vrot.lane.b32.xlu0 %v312_v39, %s1227_s19  ;;  %s1480_s26 = sld [smem:[#allocation5 + $0x106]]  ;;  %v551_v38 = vmul.f32 %v550_v33, %v1498_v53  ;;  %v655_v39 = vstv %s971_s22 }
  0xe5   : > { %v657_v40 = vmul.f32 %v655_v39, %v1446_v34  ;;  %s1698_s22 = sld [smem:[#allocation6 + $0x381]] }
  0xe8   : > { %426 = vrot.lane.b32.xlu1 %v421_v41, %s1227_s19  ;;  %330 = vrot.lane.b32.xlu0 %v326_v42, %s1228_s10  ;;  %v656_v41 = vmul.f32 %v655_v39, %v1513_v59 }
  0xea   : > { %v524_v60 = vstv %s1480_s26  ;;  %s1532_s26 = sld [smem:[#allocation5 + $0x186]] }
  0xeb   : > { %v526_v62 = vmul.f32 %v524_v60, %v1399_v14  ;;  %v525_v27 = vmul.f32 %v524_v60, %v1498_v53  ;;  %v643_v14 = vmul.f32 %v642_v36, %v1513_v59 }
  0xec   : > { %518 = vrot.lane.b32.xlu1 %v513_v45, %s1226_s6  ;;  %344 = vrot.lane.b32.xlu0 %v340_v46, %s1230_s25 }
  0xf0   : > { %610 = vrot.lane.b32.xlu1 %v605_v51, %s1225_s4  ;;  %367 = vrot.lane.b32.xlu0 %v365_v52, %s1229_s11  ;;  %v629_v11 = vstv %s1532_s26  ;;  %v244_v51 = vmul.f32 %v243_v48, %v1409_v19  ;;  %s1673_s26 = sld [smem:[#allocation6 + $0x300]] }
  0xf1   : > { %v631_v9 = vmul.f32 %v629_v11, %v1446_v34  ;;  %v630_v35 = vmul.f32 %v629_v11, %v1513_v59 }
  0xf4   : > { %439 = vrot.lane.b32.xlu1 %v434_v57, %s1228_s10  ;;  %472 = vrot.lane.b32.xlu0 %v470_v58, %s1229_s11 }
  0xf8   : > { %531 = vrot.lane.b32.xlu1 %v526_v62, %s1227_s19  ;;  %577 = vrot.lane.b32.xlu0 %v575_v63, %s1229_s11  ;;  %s932_s11 = sld [smem:[#allocation5 + $0x2]] }
  0xfc   : > { %623 = vrot.lane.b32.xlu1 %v618_v1, %s1226_s6  ;;  %411 = vrot.lane.b32.xlu0 %v407_v2, %s1226_s6 }
  0xfe   : > { %v261_v16 = vstv %s932_s11  ;;  %s1675_s11 = sld [smem:[#allocation6 + $0x1]] }
  0xff   : > { %v262_v17 = vmul.f32 %v261_v16, %v1418_v22  ;;  %v381_v22 = vmul.f32 %v380_v8, %v1485_v47  ;;  %v617_v8 = vmul.f32 %v616_v0, %v1513_v59 }
 0x100   : > { %452 = vrot.lane.b32.xlu1 %v447_v4, %s1230_s25  ;;  %503 = vrot.lane.b32.xlu0 %v499_v5, %s1225_s4 }
 0x104   : > { %544 = vrot.lane.b32.xlu1 %v539_v7, %s1228_s10  ;;  %595 = vrot.lane.b32.xlu0 %v591_v10, %s1871_s29 }
 0x108   : > { %636 = vrot.lane.b32.xlu1 %v631_v9, %s1227_s19  ;;  %424 = vrot.lane.b32.xlu0 %v420_v12, %s1227_s19 }
 0x10c   : > { %264 = vrot.lane.b32.xlu1 %v262_v17, %s1872_s20  ;;  %516 = vrot.lane.b32.xlu0 %v512_v18, %s1226_s6 }
 0x110   : > { %375 = vrot.lane.b32.xlu1 %v373_v21, %s1872_s20  ;;  %608 = vrot.lane.b32.xlu0 %v604_v23, %s1225_s4 }
 0x114   : > { %385 = vrot.lane.b32.xlu1 %v381_v22, %s1871_s29  ;;  %437 = vrot.lane.b32.xlu0 %v433_v24, %s1228_s10 }
 0x118   : > { %480 = vrot.lane.b32.xlu1 %v478_v26, %s1872_s20  ;;  %529 = vrot.lane.b32.xlu0 %v525_v27, %s1227_s19 }
 0x11c   : > { %398 = vrot.lane.b32.xlu1 %v394_v28, %s1225_s4  ;;  %621 = vrot.lane.b32.xlu0 %v617_v8, %s1226_s6  ;;  %s940_s4 = sld [smem:[#allocation5 + $0x80]] }
 0x11d   : > { %s1649_s6 = sld [smem:[#allocation5 + $0x100]] }
 0x120   : > { %490 = vrot.lane.b32.xlu1 %v486_v29, %s1871_s29  ;;  %450 = vrot.lane.b32.xlu0 %v446_v30, %s1230_s25  ;;  %s1679_s29 = sld [smem:[#allocation6 + $0x101]] }
 0x123   : > { %v460_v39 = vstv %s1649_s6  ;;  %s1750_s6 = sld [smem:[#allocation6 + $0x102]] }
 0x124   : > { %585 = vrot.lane.b32.xlu1 %v583_v13, %s1872_s20  ;;  %542 = vrot.lane.b32.xlu0 %v538_v32, %s1228_s10  ;;  %v355_v32 = vstv %s940_s4  ;;  %s1684_s20 = sld [smem:[#allocation6 + $0x201]]  ;;  %v461_v48 = vmul.f32 %v1489_v50, %v460_v39 }
 0x125   : > { %s1737_s4 = sld [smem:[#allocation6 + $0x82]] }
 0x128   : > { %557 = vrot.lane.b32.xlu1 %v552_v15, %s1230_s25  ;;  %634 = vrot.lane.b32.xlu0 %v630_v35, %s1227_s19  ;;  %s1655_s19 = sld [smem:[#allocation5 + $0x180]]  ;;  %v356_v35 = vmul.f32 %v1474_v44, %v355_v32 }
 0x12c   : > { %649 = vrot.lane.b32.xlu1 %v644_v37, %s1228_s10  ;;  %555 = vrot.lane.b32.xlu0 %v551_v38, %s1230_s25 }
 0x130   : > { %662 = vrot.lane.b32.xlu1 %v657_v40, %s1230_s25  ;;  %647 = vrot.lane.b32.xlu0 %v643_v14, %s1228_s10  ;;  %s1657_s10 = sld [smem:[#allocation6]] }
 0x134   : > { %660 = vrot.lane.b32.xlu0 %v656_v41, %s1230_s25  ;;  %s1659_s25 = sld [smem:[#allocation6 + $0x80]]  ;;  %v565_v41 = vstv %s1655_s19 }
 0x135   : > { %s1755_s19 = sld [smem:[#allocation6 + $0x182]] }
 0x136   : > { %v277_v42 = vpop.permute.xlu1 %276 }
 0x13a   : > { %v291_v43 = vpop.permute.xlu1 %290  ;;  %v1604_v45 = vpop.permute.xlu0 %387 }
 0x13e   : > { %v305_v46 = vpop.permute.xlu1 %304  ;;  %v1606_v47 = vpop.permute.xlu0 %400 }
 0x142   : > { %v319_v34 = vpop.permute.xlu1 %318  ;;  %v1608_v49 = vpop.permute.xlu0 %492 }
 0x146   : > { %v333_v52 = vpop.permute.xlu1 %332  ;;  %v257_v53 = vpop.permute.xlu0 %256 }
 0x147   : > { %v259_v54 = vadd.f32 %v257_v53, %v244_v51  ;;  %v566_v51 = vmul.f32 %v1504_v56, %v565_v41 }
 0x14a   : > { %v347_v55 = vpop.permute.xlu1 %346  ;;  %v275_v57 = vpop.permute.xlu0 %274 }
 0x14b   : > { %v279_v58 = vsel %vm278_vm1, %v275_v57, %v277_v42  ;;  %v685_v57 = vstv %s1659_s25  ;;  %s1766_s25 = sld [smem:[#allocation6 + $0x282]] }
 0x14e   : > { %v1612_v59 = vpop.permute.xlu1 %413  ;;  %v289_v60 = vpop.permute.xlu0 %288 }
 0x14f   : > { %v293_v61 = vsel %vm292_vm2, %v289_v60, %v291_v43  ;;  %v736_v60 = vstv %s1667_s21  ;;  %s1774_s21 = sld [smem:[#allocation6 + $0x3]] }
 0x152   : > { %v1615_v62 = vpop.permute.xlu1 %505  ;;  %v303_v63 = vpop.permute.xlu0 %302 }
 0x153   : > { %v307_v19 = vsel %vm306_vm3, %v303_v63, %v305_v46  ;;  %v770_v63 = vstv %s1673_s26  ;;  %s1778_s26 = sld [smem:[#allocation6 + $0x103]] }
 0x156   : > { %v1618_v0 = vpop.permute.xlu1 %597  ;;  %v317_v1 = vpop.permute.xlu0 %316 }
 0x157   : > { %v321_v2 = vsel %vm320_vm4, %v317_v1, %v319_v34  ;;  %v671_v1 = vstv %s1675_s11  ;;  %s1780_s11 = sld [smem:[#allocation6 + $0x183]] }
 0x15a   : > { %v1621_v3 = vpop.permute.xlu1 %426  ;;  %v331_v4 = vpop.permute.xlu0 %330 }
 0x15b   : > { %v335_v5 = vsel %vm334_vm5, %v331_v4, %v333_v52  ;;  %v668_v52 = vstv %s1657_s10  ;;  %s1761_s10 = sld [smem:[#allocation6 + $0x202]] }
 0x15e   : > { %v1624_v6 = vpop.permute.xlu1 %518  ;;  %v345_v7 = vpop.permute.xlu0 %344 }
 0x15f   : > { %v349_v10 = vsel %vm348_vm6, %v345_v7, %v347_v55  ;;  %v722_v7 = vstv %s1682_s8  ;;  %s1798_s8 = sld [smem:[#allocation6 + $0x303]] }
 0x162   : > { %v1627_v11 = vpop.permute.xlu1 %610  ;;  %v368_v9 = vpop.permute.xlu0 %367 }
 0x163   : > { %v370_v14 = vadd.f32 %v368_v9, %v356_v35 }
 0x166   : > { %v1629_v12 = vpop.permute.xlu1 %439  ;;  %v1631_v16 = vpop.permute.xlu0 %472 }
 0x167   : > { %v475_v56 = vadd.f32 %v1631_v16, %v461_v48 }
 0x16a   : > { %v1633_v17 = vpop.permute.xlu1 %531  ;;  %v1635_v18 = vpop.permute.xlu0 %577 }
 0x16e   : > { %v1637_v20 = vpop.permute.xlu1 %623  ;;  %v1639_v21 = vpop.permute.xlu0 %411 }
 0x16f   : > { %v415_v4 = vsel %vm306_vm3, %v1639_v21, %v1612_v59  ;;  %v580_v59 = vadd.f32 %v1635_v18, %v566_v51 }
 0x172   : > { %v1641_v23 = vpop.permute.xlu1 %452  ;;  %v1643_v22 = vpop.permute.xlu0 %503 }
 0x173   : > { %v507_v21 = vsel %vm292_vm2, %v1643_v22, %v1615_v62 }
 0x176   : > { %v1645_v24 = vpop.permute.xlu1 %544  ;;  %v1647_v25 = vpop.permute.xlu0 %595 }
 0x17a   : > { %v1651_v26 = vpop.permute.xlu1 %636  ;;  %v1653_v27 = vpop.permute.xlu0 %424 }
 0x17b   : > { %v428_v16 = vsel %vm320_vm4, %v1653_v27, %v1621_v3  ;;  %v599_v3 = vsel %vm278_vm1, %v1647_v25, %v1618_v0 }
 0x17e   : > { %v265_v28 = vpop.permute.xlu1 %264  ;;  %v1661_v8 = vpop.permute.xlu0 %516 }
 0x17f   : > { %v267_v29 = vadd.f32 %v265_v28, %v259_v54 }
 0x181   : > { %v281_v30 = vadd.f32 %v279_v58, %v267_v29  ;;  %v702_v58 = vstv %s1663_s24  ;;  %v756_v29 = vstv %s1686_s18  ;;  %s1770_s24 = sld [smem:[#allocation6 + $0x302]]  ;;  %s1013_s18 = sshll.u32 %s1881_s15, 5 }
 0x182   : > { %v376_v31 = vpop.permute.xlu1 %375  ;;  %v1671_v13 = vpop.permute.xlu0 %608 }
 0x183   : > { %v295_v33 = vadd.f32 %v293_v61, %v281_v30  ;;  %v378_v34 = vadd.f32 %v376_v31, %v370_v14  ;;  %v753_v61 = vstv %s1669_s12  ;;  %v773_v30 = vstv %s1689_s30  ;;  %s1776_s12 = sld [smem:[#allocation6 + $0x83]] }
 0x184   : > { %v612_v18 = vsel %vm292_vm2, %v1671_v13, %v1627_v11 }
 0x185   : > { %v309_v15 = vadd.f32 %v307_v19, %v295_v33  ;;  %v787_v33 = vstv %s1692_s5 }
 0x186   : > { %v386_v36 = vpop.permute.xlu1 %385  ;;  %v438_v37 = vpop.permute.xlu0 %437 }
 0x187   : > { %v323_v38 = vadd.f32 %v321_v2, %v309_v15  ;;  %v389_v46 = vsel %vm278_vm1, %v386_v36, %v1604_v45  ;;  %v719_v45 = vstv %s1665_s28  ;;  %v688_v2 = vstv %s1677_s7  ;;  %s1772_s28 = sld [smem:[#allocation6 + $0x382]] }
 0x188   : > { %v391_v53 = vadd.f32 %v389_v46, %v378_v34  ;;  %v790_v15 = vstv %s1698_s22  ;;  %v441_v27 = vsel %vm334_vm5, %v438_v37, %v1629_v12  ;;  %s1788_s7 = sld [smem:[#allocation6 + $0x203]]  ;;  %s240_s22 = scalar_lea.vmem %s1852_s3, %s1013_s18 }
 0x189   : > { %v337_v40 = vadd.f32 %v335_v5, %v323_v38  ;;  %v705_v5 = vstv %s1679_s29  ;;  %s1792_s29 = sld [smem:[#allocation6 + $0x283]] }
 0x18a   : > { %v481_v44 = vpop.permute.xlu1 %480  ;;  %v530_v42 = vpop.permute.xlu0 %529 }
 0x18b   : > { %v1694_v43 = vadd.f32 %v349_v10, %v337_v40  ;;  %v739_v10 = vstv %s1684_s20  ;;  %v483_v9 = vadd.f32 %v481_v44, %v475_v56  ;;  %v533_v62 = vsel %vm320_vm4, %v530_v42, %v1633_v17  ;;  %s1804_s20 = sld [smem:[#allocation6 + $0x383]] }
 0x18d   : > { %v669_v0 = vmul.f32 %v668_v52, %v1694_v43  ;;  %v686_v11 = vmul.f32 %v685_v57, %v1694_v43  ;;  %v703_v12 = vmul.f32 %v702_v58, %v1694_v43  ;;  %v720_v17 = vmul.f32 %v719_v45, %v1694_v43 }
 0x18e   : > { %v399_v54 = vpop.permute.xlu1 %398  ;;  %v1703_v55 = vpop.permute.xlu0 %621  ;;  %v737_v37 = vmul.f32 %v736_v60, %v1694_v43  ;;  %v754_v40 = vmul.f32 %v753_v61, %v1694_v43  ;;  %v771_v14 = vmul.f32 %v770_v63, %v1694_v43 }
 0x18f   : > { %v402_v50 = vsel %vm292_vm2, %v399_v54, %v1606_v47 }
 0x190   : > { %v404_v19 = vadd.f32 %v402_v50, %v391_v53 }
 0x192   : > { %v417_v47 = vadd.f32 %v415_v4, %v404_v19  ;;  %v491_v28 = vpop.permute.xlu1 %490  ;;  %v451_v31 = vpop.permute.xlu0 %450 }
 0x193   : > { %v494_v32 = vsel %vm278_vm1, %v491_v28, %v1608_v49  ;;  %v520_v49 = vsel %vm306_vm3, %v1661_v8, %v1624_v6  ;;  %v454_v6 = vsel %vm348_vm6, %v451_v31, %v1641_v23  ;;  %v788_v23 = vmul.f32 %v787_v33, %v1694_v43 }
 0x194   : > { %v496_v35 = vadd.f32 %v494_v32, %v483_v9  ;;  %v430_v36 = vadd.f32 %v428_v16, %v417_v47  ;;  %v675_v28 = vstv %s1731_s23  ;;  %v709_v31 = vstv %s1750_s6 }
 0x195   : > { %v726_v16 = vstv %s1755_s19  ;;  %v777_v32 = vstv %s1770_s24  ;;  %v794_v33 = vstv %s1772_s28 }
 0x196   : > { %v509_v22 = vadd.f32 %v507_v21, %v496_v35  ;;  %v443_v38 = vadd.f32 %v441_v27, %v430_v36  ;;  %v586_v25 = vpop.permute.xlu1 %585  ;;  %v543_v39 = vpop.permute.xlu0 %542 }
 0x197   : > { %v588_v8 = vadd.f32 %v586_v25, %v580_v59 }
 0x198   : > { %v456_v13 = vadd.f32 %v454_v6, %v443_v38  ;;  %v522_v44 = vadd.f32 %v520_v49, %v509_v22 }
 0x199   : > { %v601_v41 = vadd.f32 %v599_v3, %v588_v8 }
 0x19a   : > { %v672_v42 = vmul.f32 %v671_v1, %v456_v13  ;;  %v689_v46 = vmul.f32 %v688_v2, %v456_v13  ;;  %v706_v48 = vmul.f32 %v705_v5, %v456_v13  ;;  %v723_v34 = vmul.f32 %v722_v7, %v456_v13  ;;  %v635_v51 = vpop.permute.xlu0 %634  ;;  %v558_v58 = vpop.permute.xlu1 %557 }
 0x19b   : > { %v740_v52 = vmul.f32 %v739_v10, %v456_v13  ;;  %v757_v53 = vmul.f32 %v756_v29, %v456_v13  ;;  %v774_v54 = vmul.f32 %v773_v30, %v456_v13  ;;  %v791_v57 = vmul.f32 %v790_v15, %v456_v13 }
 0x19c   : > { %v673_v45 = vadd.f32 %v672_v42, %v669_v0  ;;  %v690_v43 = vadd.f32 %v689_v46, %v686_v11  ;;  %v707_v50 = vadd.f32 %v706_v48, %v703_v12  ;;  %v724_v60 = vadd.f32 %v723_v34, %v720_v17 }
 0x19d   : > { %v741_v61 = vadd.f32 %v740_v52, %v737_v37  ;;  %v758_v63 = vadd.f32 %v757_v53, %v754_v40  ;;  %v775_v56 = vadd.f32 %v774_v54, %v771_v14  ;;  %v792_v19 = vadd.f32 %v791_v57, %v788_v23 }
 0x19e   : > { %v614_v1 = vadd.f32 %v612_v18, %v601_v41  ;;  %v535_v2 = vadd.f32 %v533_v62, %v522_v44  ;;  %v556_v4 = vpop.permute.xlu0 %555  ;;  %v625_v5 = vsel %vm306_vm3, %v1703_v55, %v1637_v20  ;;  %v546_v7 = vsel %vm334_vm5, %v543_v39, %v1645_v24  ;;  %v650_v30 = vpop.permute.xlu1 %649 }
 0x19f   : > { %v559_v10 = vsel %vm348_vm6, %v556_v4, %v558_v58  ;;  %v692_v29 = vstv %s1737_s4  ;;  %v743_v20 = vstv %s1761_s10  ;;  %v760_v55 = vstv %s1766_s25 }
 0x1a0   : > { %v548_v9 = vadd.f32 %v546_v7, %v535_v2  ;;  %v627_v47 = vadd.f32 %v625_v5, %v614_v1  ;;  %v638_v24 = vsel %vm320_vm4, %v635_v51, %v1651_v26  ;;  %v679_v40 = vstv %s1774_s21 }
 0x1a1   : > { %v696_v23 = vstv %s1776_s12  ;;  %v713_v41 = vstv %s1778_s26  ;;  %v730_v44 = vstv %s1780_s11  ;;  %v747_v42 = vstv %s1788_s7 }
 0x1a2   : > { %v561_v15 = vadd.f32 %v559_v10, %v548_v9  ;;  %v648_v59 = vpop.permute.xlu0 %647  ;;  %v640_v21 = vadd.f32 %v638_v24, %v627_v47  ;;  %v663_v17 = vpop.permute.xlu1 %662  ;;  %v764_v46 = vstv %s1792_s29  ;;  %v781_v48 = vstv %s1798_s8 }
 0x1a3   : > { %v651_v35 = vsel %vm334_vm5, %v648_v59, %v650_v30  ;;  %v798_v34 = vstv %s1804_s20 }
 0x1a4   : > { %v676_v36 = vmul.f32 %v675_v28, %v561_v15  ;;  %v693_v3 = vmul.f32 %v692_v29, %v561_v15  ;;  %v710_v49 = vmul.f32 %v709_v31, %v561_v15  ;;  %v727_v18 = vmul.f32 %v726_v16, %v561_v15 }
 0x1a5   : > { %v744_v27 = vmul.f32 %v743_v20, %v561_v15  ;;  %v761_v62 = vmul.f32 %v760_v55, %v561_v15  ;;  %v778_v26 = vmul.f32 %v777_v32, %v561_v15  ;;  %v795_v22 = vmul.f32 %v794_v33, %v561_v15 }
 0x1a6   : > { %v677_v38 = vadd.f32 %v676_v36, %v673_v45  ;;  %v694_v0 = vadd.f32 %v693_v3, %v690_v43  ;;  %v711_v25 = vadd.f32 %v710_v49, %v707_v50  ;;  %v728_v39 = vadd.f32 %v727_v18, %v724_v60  ;;  %v661_v6 = vpop.permute.xlu0 %660 }
 0x1a7   : > { %v745_v11 = vadd.f32 %v744_v27, %v741_v61  ;;  %v762_v12 = vadd.f32 %v761_v62, %v758_v63  ;;  %v779_v8 = vadd.f32 %v778_v26, %v775_v56  ;;  %v796_v13 = vadd.f32 %v795_v22, %v792_v19 }
 0x1a8   : > { %v653_v37 = vadd.f32 %v651_v35, %v640_v21  ;;  %v664_v14 = vsel %vm348_vm6, %v661_v6, %v663_v17 }
 0x1aa   : > { %v666_v51 = vadd.f32 %v664_v14, %v653_v37 }
 0x1ac   : > { %v680_v52 = vmul.f32 %v679_v40, %v666_v51  ;;  %v697_v53 = vmul.f32 %v696_v23, %v666_v51  ;;  %v714_v54 = vmul.f32 %v713_v41, %v666_v51  ;;  %v731_v57 = vmul.f32 %v730_v44, %v666_v51 }
 0x1ad   : > { %v748_v58 = vmul.f32 %v747_v42, %v666_v51  ;;  %v765_v45 = vmul.f32 %v764_v46, %v666_v51  ;;  %v782_v43 = vmul.f32 %v781_v48, %v666_v51  ;;  %v799_v50 = vmul.f32 %v798_v34, %v666_v51 }
 0x1ae   : > { %v681_v60 = vadd.f32 %v680_v52, %v677_v38  ;;  %v698_v61 = vadd.f32 %v697_v53, %v694_v0  ;;  %v715_v63 = vadd.f32 %v714_v54, %v711_v25  ;;  %v732_v56 = vadd.f32 %v731_v57, %v728_v39 }
 0x1af   : > { %v749_v19 = vadd.f32 %v748_v58, %v745_v11  ;;  %v766_v1 = vadd.f32 %v765_v45, %v762_v12  ;;  %v783_v2 = vadd.f32 %v782_v43, %v779_v8  ;;  %v800_v4 = vadd.f32 %v799_v50, %v796_v13 }
 0x1b0   : > { %683 = vst.msk [vmem:[%s240_s22] sm:$0x7] %vm682_vm7, %v681_v60  ;;  %979 = vst.msk [vmem:[%s240_s22 + $0x4] sm:$0x7] %vm682_vm7, %v698_v61 }
 0x1b1   : > { %984 = vst.msk [vmem:[%s240_s22 + $0x8] sm:$0x7] %vm682_vm7, %v715_v63  ;;  %989 = vst.msk [vmem:[%s240_s22 + $0xc] sm:$0x7] %vm682_vm7, %v732_v56 }
 0x1b2   : > { %994 = vst.msk [vmem:[%s240_s22 + $0x10] sm:$0x7] %vm682_vm7, %v749_v19  ;;  %999 = vst.msk [vmem:[%s240_s22 + $0x14] sm:$0x7] %vm682_vm7, %v766_v1 }
 0x1b3   : > { %1004 = vst.msk [vmem:[%s240_s22 + $0x18] sm:$0x7] %vm682_vm7, %v783_v2  ;;  %1009 = vst.msk [vmem:[%s240_s22 + $0x1c] sm:$0x7] %vm682_vm7, %v800_v4 }
 0x1b4 PF: > { %s18_s17 = sadd.s32 1, %s1216_s17   ;;  %s1873_s12 = smov %s1200_s13 }
 0x1b5   : > { %p15_p3 = scmp.ge.s32.totalorder %s18_s17, 4   ;;  %s1874_s13 = smov %s1204_s14 }
 0x1b6   : > { %s1875_s14 = smov %s1339_s27  ;;  %s1876_s15 = smov %s1212_s16 }
 0x1b7   : > { %s1877_s16 = smov %s1879_s9  ;;  %17 = sbr.rel (!%p15_p3) target bundleno = 6 (0x6), region = 91 }
 0x1bc   :  { %830 = vsyncpa [#allocation3], 1 }
 0x1bd   :  { %832 = vsyncpa [#allocation3 + $0x1], 1 }
 0x1be   :  { %833 = vsyncpa [#allocation4], 1 }
 0x1bf   :  { %835 = vsyncpa [#allocation4 + $0x1], 1 }
 0x1c0   :  { %836 = vsyncpa [#allocation7], 1 }

</bundles_post_ra>
